<compile_context>
chip_gen: v5e
topology: v5e:2x2
jax: 0.10.0
libtpu: 0.0.40
codegen_flags: <defaults>
</compile_context>

<pallas_src>
import functools

import jax
import jax.numpy as jnp
import numpy as np
from jax import lax
from jax.experimental import pallas as pl
from jax.experimental.pallas import tpu as pltpu


def _round_up(x, m):
    return (x + m - 1) // m * m


def _gru_encoder_kernel(x_ref, h0_ref, wi_ref, wh_ref, bi_ref, bhn_ref,
                        out_ref, gi_ref):
    """Whole GRU-over-sequence in one invocation.

    x_ref   : (S*Bp, E)     bf16  embedded tokens (time-major, batch padded)
    h0_ref  : (Bp, Hp)      f32   initial hidden state (zero padded)
    wi_ref  : (E, 3*Hp)     bf16  packed input weights  [W_ir | W_iz | W_in]^T
    wh_ref  : (Hp, 3*Hp)    bf16  packed hidden weights [W_hr | W_hz | W_hn]^T
    bi_ref  : (1, 3*Hp)     f32   [b_ir+b_hr | b_iz+b_hz | b_in]
    bhn_ref : (1, Hp)       f32   b_hn (applied inside r * (.))
    out_ref : (S, Bp, Hp)   f32   hidden state after every timestep
    gi_ref  : (S, Bp, 3*Hp) f32   VMEM scratch for the non-recurrent prepass
    """
    S, Bp, Hp = out_ref.shape

    # ---- Non-recurrent prepass: all input projections in ONE MXU matmul. ----
    gi = (jnp.dot(x_ref[...], wi_ref[...],
                  preferred_element_type=jnp.float32)
          + bi_ref[...])                                    # (S*Bp, 3Hp) f32
    gi_ref[...] = gi.reshape(S, Bp, 3 * Hp)                 # leading time axis

    wh = wh_ref[...]                                        # (Hp, 3Hp) bf16
    bhn = bhn_ref[...]                                      # (1, Hp)   f32

    # ---- Sequential recurrence.  PyTorch GRU gate order (r, z, n):
    #   r  = sigmoid(W_ir x + b_ir + W_hr h + b_hr)
    #   z  = sigmoid(W_iz x + b_iz + W_hz h + b_hz)
    #   n  = tanh  (W_in x + b_in + r * (W_hn h + b_hn))
    #   h' = (1 - z) * n + z * h
    def step(t, h):
        gi_t = gi_ref[t]                                    # (Bp, 3Hp) whole-tile
        gh = jnp.dot(h.astype(wh.dtype), wh,
                     preferred_element_type=jnp.float32)    # one MXU op / step
        # n-gate VPU add issued before the EUP sigmoid so VPU/EUP overlap.
        ghn = gh[:, 2 * Hp:] + bhn
        rz = jax.nn.sigmoid(gi_t[:, :2 * Hp] + gh[:, :2 * Hp])  # fused 2H sigmoid
        r = rz[:, :Hp]
        z = rz[:, Hp:]
        n = jnp.tanh(gi_t[:, 2 * Hp:] + r * ghn)
        h_new = (1.0 - z) * n + z * h
        out_ref[t] = h_new.astype(out_ref.dtype)
        return h_new

    lax.fori_loop(0, S, step, h0_ref[...], unroll=min(S, 8))


def pack_encoder_params(w_ih, w_hh, b_ih, b_hh):
    """One-time (init-time) packing of PyTorch GRU params (gate order r,z,n).

    Pads each gate's hidden dim to a multiple of 128 lanes so every in-kernel
    gate slice is lane-aligned.  Zero-padded weights/biases keep padded hidden
    lanes exactly 0 throughout the recurrence, so no correctness impact.
    """
    threeH, E = w_ih.shape
    H = threeH // 3
    assert w_ih.shape == (3 * H, E), "expect PyTorch (3H, E) layout, gates r,z,n"
    assert w_hh.shape == (3 * H, H)
    Hp = max(_round_up(H, 128), 128)
    pad_h = Hp - H

    wi = jnp.pad(w_ih.reshape(3, H, E), ((0, 0), (0, pad_h), (0, 0)))
    wi = wi.reshape(3 * Hp, E).T.astype(jnp.bfloat16)           # (E, 3Hp)

    wh = jnp.pad(w_hh.reshape(3, H, H), ((0, 0), (0, pad_h), (0, pad_h)))
    wh = wh.reshape(3 * Hp, Hp).T.astype(jnp.bfloat16)          # (Hp, 3Hp)

    b_i = jnp.pad(b_ih.reshape(3, H), ((0, 0), (0, pad_h)))
    b_h = jnp.pad(b_hh.reshape(3, H), ((0, 0), (0, pad_h)))
    # Fold b_hr, b_hz into the input-side bias; keep b_hn separate (it sits
    # inside r * (W_hn h + b_hn)).
    bi = (b_i + b_h.at[2].set(0.0)).reshape(1, 3 * Hp).astype(jnp.float32)
    bhn = b_h[2].reshape(1, Hp).astype(jnp.float32)
    return wi, wh, bi, bhn


@jax.jit
def encoder_forward(tokens, hidden0, emb_weight, wi, wh, bi, bhn):
    """Mirrors Encoder.forward: embedding lookup + per-timestep GRU.

    tokens  : (S, B) int32,  hidden0 : (1, B, H) f32,  emb_weight : (V, E) f32
    wi/wh/bi/bhn : pre-packed by pack_encoder_params (done once at init).
    returns : (S, B, H) f32  (stacked per-step hiddens)
    """
    S, B = tokens.shape
    H = hidden0.shape[2]
    E = emb_weight.shape[1]
    Hp = wh.shape[0]
    Bp = max(_round_up(B, 8), 8)

    # TODO(synk): fuse the embedding gather into the prepass (scalar-prefetched
    # token ids + row-gather DMA) once S*B*E is large enough to matter.
    embedded = emb_weight[tokens]                               # (S, B, E) gather
    x = jnp.pad(embedded, ((0, 0), (0, Bp - B), (0, 0)))        # (S, Bp, E)
    x2d = x.reshape(S * Bp, E).astype(jnp.bfloat16)

    h0 = jnp.pad(hidden0[0], ((0, Bp - B), (0, Hp - H)))        # (Bp, Hp) f32

    # VMEM footprint of the fully-resident design (+ headroom).
    vmem_bytes = (x2d.size * 2 + Bp * Hp * 4 + wi.size * 2 + wh.size * 2
                  + bi.size * 4 + bhn.size * 4
                  + S * Bp * Hp * 4          # output
                  + S * Bp * 3 * Hp * 4)     # gi scratch
    vmem_limit = int(min(max(2 * vmem_bytes + (1 << 20), 16 << 20), 120 << 20))
    # TODO(synk): at realistic S/B/H (esp. v7x's 64 MiB VMEM) switch to a tiled
    # pipelined prepass + HBM-double-buffered recurrence, and shard the batch
    # over v7x's two TensorCores with a leading "parallel" grid axis.

    vmem = pl.BlockSpec(memory_space=pltpu.MemorySpace.VMEM)
    out = pl.pallas_call(
        _gru_encoder_kernel,
        out_shape=jax.ShapeDtypeStruct((S, Bp, Hp), jnp.float32),
        in_specs=[vmem] * 6,
        out_specs=vmem,
        scratch_shapes=[pltpu.VMEM((S, Bp, 3 * Hp), jnp.float32)],
        compiler_params=pltpu.CompilerParams(vmem_limit_bytes=vmem_limit),
    )(x2d, h0, wi, wh, bi, bhn)
    return out[:, :B, :H]


def _reference_forward(tokens, hidden0, emb_weight, w_ih, w_hh, b_ih, b_hh):
    """Pure-JAX f32 reference of the PyTorch forward (for validation)."""
    H = w_hh.shape[1]
    embedded = emb_weight[tokens]                  # (S, B, E)
    h = hidden0[0]

    def step(h, x):
        gi = x @ w_ih.T + b_ih
        gh = h @ w_hh.T + b_hh
        r = jax.nn.sigmoid(gi[:, 0:H] + gh[:, 0:H])
        z = jax.nn.sigmoid(gi[:, H:2 * H] + gh[:, H:2 * H])
        n = jnp.tanh(gi[:, 2 * H:] + r * gh[:, 2 * H:])
        h_new = (1.0 - z) * n + z * h
        return h_new, h_new

    _, hs = jax.lax.scan(step, h, embedded)
    return hs                                      # (S, B, H)


if __name__ == "__main__":
    # Small shapes consistent with the module.
    vocab, emb_dim = 50, 32        # embedding = (50, 32)
    hidden_size = 32
    num_layers = 1
    batch = 2
    seq_len = 8

    key = jax.random.PRNGKey(0)
    k_emb, k_wih, k_whh, k_bih, k_bhh, k_tok = jax.random.split(key, 6)

    # Deterministic init (xavier-normal embedding, uniform GRU like PyTorch).
    xavier_std = float(np.sqrt(2.0 / (vocab + emb_dim)))
    emb_weight = jax.random.normal(k_emb, (vocab, emb_dim), jnp.float32) * xavier_std
    bound = 1.0 / np.sqrt(hidden_size)
    w_ih = jax.random.uniform(k_wih, (3 * hidden_size, emb_dim), jnp.float32, -bound, bound)
    w_hh = jax.random.uniform(k_whh, (3 * hidden_size, hidden_size), jnp.float32, -bound, bound)
    b_ih = jax.random.uniform(k_bih, (3 * hidden_size,), jnp.float32, -bound, bound)
    b_hh = jax.random.uniform(k_bhh, (3 * hidden_size,), jnp.float32, -bound, bound)

    tokens = jax.random.randint(k_tok, (seq_len, batch), 0, vocab, jnp.int32)
    hidden0 = jnp.zeros((num_layers, batch, hidden_size), jnp.float32)  # init_hidden()

    # One-time weight packing (hoisted out of the per-call forward path).
    wi, wh, bi, bhn = pack_encoder_params(w_ih, w_hh, b_ih, b_hh)

    out = encoder_forward(tokens, hidden0, emb_weight, wi, wh, bi, bhn)
    out = jax.block_until_ready(out)

    ref = _reference_forward(tokens, hidden0, emb_weight, w_ih, w_hh, b_ih, b_hh)
    assert out.shape == (seq_len, batch, hidden_size)
    # Tolerance accounts for bf16 MXU operands (f32 accumulation) vs f32 ref.
    np.testing.assert_allclose(np.asarray(out), np.asarray(ref), rtol=5e-2, atol=5e-3)

    print("KERNEL_OK")
</pallas_src>

<mosaic_0001>
module attributes {stable_mosaic.version = 11 : i64} {
  func.func @_gru_encoder_kernel(%arg0: memref<64x32xbf16, #tpu.memory_space<vmem>>, %arg1: memref<8x128xf32, #tpu.memory_space<vmem>>, %arg2: memref<32x384xbf16, #tpu.memory_space<vmem>>, %arg3: memref<128x384xbf16, #tpu.memory_space<vmem>>, %arg4: memref<1x384xf32, #tpu.memory_space<vmem>>, %arg5: memref<1x128xf32, #tpu.memory_space<vmem>>, %arg6: memref<8x8x128xf32, #tpu.memory_space<vmem>>, %arg7: memref<8x8x384xf32, #tpu.memory_space<vmem>>) attributes {dimension_semantics = [], scalar_prefetch = 0 : i64, scratch_operands = 1 : i64, tpu.core_type = #tpu.core_type<tc>} {
    %c0 = arith.constant 0 : index
    %c0_0 = arith.constant 0 : index
    %0 = vector.load %arg0[%c0, %c0_0] : memref<64x32xbf16, #tpu.memory_space<vmem>>, vector<64x32xbf16>
    %c0_1 = arith.constant 0 : index
    %c0_2 = arith.constant 0 : index
    %1 = vector.load %arg2[%c0_1, %c0_2] : memref<32x384xbf16, #tpu.memory_space<vmem>>, vector<32x384xbf16>
    %cst = arith.constant dense<0.000000e+00> : vector<64x384xf32>
    %2 = tpu.matmul %0, %1, %cst {dimension_numbers = #tpu.dot_dimension_numbers<[1], [0], [0], [1], [0, 0, 1, 1], [], []>} : vector<64x32xbf16>, vector<32x384xbf16>, vector<64x384xf32> -> vector<64x384xf32>
    %c0_3 = arith.constant 0 : index
    %c0_4 = arith.constant 0 : index
    %3 = vector.load %arg4[%c0_3, %c0_4] : memref<1x384xf32, #tpu.memory_space<vmem>>, vector<1x384xf32>
    %4 = vector.broadcast %3 : vector<1x384xf32> to vector<64x384xf32>
    %5 = arith.addf %2, %4 : vector<64x384xf32>
    %6 = vector.shape_cast %5 : vector<64x384xf32> to vector<8x8x384xf32>
    %c0_5 = arith.constant 0 : index
    %c0_6 = arith.constant 0 : index
    %c0_7 = arith.constant 0 : index
    %7 = vector.load %arg7[%c0_5, %c0_6, %c0_7] : memref<8x8x384xf32, #tpu.memory_space<vmem>>, vector<8x8x384xf32>
    tpu.vector_store %arg7[%c0_5, %c0_6, %c0_7], %6 {strides = array<i32>} : memref<8x8x384xf32, #tpu.memory_space<vmem>>, vector<8x8x384xf32>,
    %c0_8 = arith.constant 0 : index
    %c0_9 = arith.constant 0 : index
    %8 = vector.load %arg3[%c0_8, %c0_9] : memref<128x384xbf16, #tpu.memory_space<vmem>>, vector<128x384xbf16>
    %c0_10 = arith.constant 0 : index
    %c0_11 = arith.constant 0 : index
    %9 = vector.load %arg5[%c0_10, %c0_11] : memref<1x128xf32, #tpu.memory_space<vmem>>, vector<1x128xf32>
    %c0_12 = arith.constant 0 : index
    %c0_13 = arith.constant 0 : index
    %10 = vector.load %arg1[%c0_12, %c0_13] : memref<8x128xf32, #tpu.memory_space<vmem>>, vector<8x128xf32>
    %c0_i32 = arith.constant 0 : i32
    %11 = arith.index_cast %c0_i32 : i32 to index
    %c0_14 = arith.constant 0 : index
    %c0_15 = arith.constant 0 : index
    %12 = vector.load %arg7[%11, %c0_14, %c0_15] : memref<8x8x384xf32, #tpu.memory_space<vmem>>, vector<1x8x384xf32>
    %13 = vector.shape_cast %12 : vector<1x8x384xf32> to vector<8x384xf32>
    %14 = arith.truncf %10 : vector<8x128xf32> to vector<8x128xbf16>
    %cst_16 = arith.constant dense<0.000000e+00> : vector<8x384xf32>
    %15 = tpu.matmul %14, %8, %cst_16 {dimension_numbers = #tpu.dot_dimension_numbers<[1], [0], [0], [1], [0, 0, 1, 1], [], []>} : vector<8x128xbf16>, vector<128x384xbf16>, vector<8x384xf32> -> vector<8x384xf32>
    %16 = vector.extract_strided_slice %15 {offsets = [0, 256], sizes = [8, 128], strides = [1, 1]} : vector<8x384xf32> to vector<8x128xf32>
    %17 = vector.broadcast %9 : vector<1x128xf32> to vector<8x128xf32>
    %18 = arith.addf %16, %17 : vector<8x128xf32>
    %19 = vector.extract_strided_slice %13 {offsets = [0, 0], sizes = [8, 256], strides = [1, 1]} : vector<8x384xf32> to vector<8x256xf32>
    %20 = vector.extract_strided_slice %15 {offsets = [0, 0], sizes = [8, 256], strides = [1, 1]} : vector<8x384xf32> to vector<8x256xf32>
    %21 = arith.addf %19, %20 : vector<8x256xf32>
    %22 = arith.negf %21 : vector<8x256xf32>
    %23 = math.exp %22 : vector<8x256xf32>
    %cst_17 = arith.constant 1.000000e+00 : f32
    %24 = vector.broadcast %cst_17 : f32 to vector<8x256xf32>
    %25 = arith.addf %24, %23 : vector<8x256xf32>
    %26 = arith.divf %24, %25 : vector<8x256xf32>
    %27 = vector.extract_strided_slice %26 {offsets = [0, 0], sizes = [8, 128], strides = [1, 1]} : vector<8x256xf32> to vector<8x128xf32>
    %28 = vector.extract_strided_slice %26 {offsets = [0, 128], sizes = [8, 128], strides = [1, 1]} : vector<8x256xf32> to vector<8x128xf32>
    %29 = vector.extract_strided_slice %13 {offsets = [0, 256], sizes = [8, 128], strides = [1, 1]} : vector<8x384xf32> to vector<8x128xf32>
    %30 = arith.mulf %27, %18 : vector<8x128xf32>
    %31 = arith.addf %29, %30 : vector<8x128xf32>
    %32 = math.tanh %31 : vector<8x128xf32>
    %cst_18 = arith.constant 1.000000e+00 : f32
    %33 = vector.broadcast %cst_18 : f32 to vector<8x128xf32>
    %34 = arith.subf %33, %28 : vector<8x128xf32>
    %35 = arith.mulf %34, %32 : vector<8x128xf32>
    %36 = arith.mulf %28, %10 : vector<8x128xf32>
    %37 = arith.addf %35, %36 : vector<8x128xf32>
    %38 = arith.index_cast %c0_i32 : i32 to index
    %c0_19 = arith.constant 0 : index
    %c0_20 = arith.constant 0 : index
    %39 = vector.load %arg6[%38, %c0_19, %c0_20] : memref<8x8x128xf32, #tpu.memory_space<vmem>>, vector<1x8x128xf32>
    %40 = vector.shape_cast %39 : vector<1x8x128xf32> to vector<8x128xf32>
    %41 = vector.shape_cast %37 : vector<8x128xf32> to vector<1x8x128xf32>
    tpu.vector_store %arg6[%38, %c0_19, %c0_20], %41 {strides = array<i32>} : memref<8x8x128xf32, #tpu.memory_space<vmem>>, vector<1x8x128xf32>,
    %c1_i32 = arith.constant 1 : i32
    %42 = arith.index_cast %c1_i32 : i32 to index
    %c0_21 = arith.constant 0 : index
    %c0_22 = arith.constant 0 : index
    %43 = vector.load %arg7[%42, %c0_21, %c0_22] : memref<8x8x384xf32, #tpu.memory_space<vmem>>, vector<1x8x384xf32>
    %44 = vector.shape_cast %43 : vector<1x8x384xf32> to vector<8x384xf32>
    %45 = arith.truncf %37 : vector<8x128xf32> to vector<8x128xbf16>
    %cst_23 = arith.constant dense<0.000000e+00> : vector<8x384xf32>
    %46 = tpu.matmul %45, %8, %cst_23 {dimension_numbers = #tpu.dot_dimension_numbers<[1], [0], [0], [1], [0, 0, 1, 1], [], []>} : vector<8x128xbf16>, vector<128x384xbf16>, vector<8x384xf32> -> vector<8x384xf32>
    %47 = vector.extract_strided_slice %46 {offsets = [0, 256], sizes = [8, 128], strides = [1, 1]} : vector<8x384xf32> to vector<8x128xf32>
    %48 = vector.broadcast %9 : vector<1x128xf32> to vector<8x128xf32>
    %49 = arith.addf %47, %48 : vector<8x128xf32>
    %50 = vector.extract_strided_slice %44 {offsets = [0, 0], sizes = [8, 256], strides = [1, 1]} : vector<8x384xf32> to vector<8x256xf32>
    %51 = vector.extract_strided_slice %46 {offsets = [0, 0], sizes = [8, 256], strides = [1, 1]} : vector<8x384xf32> to vector<8x256xf32>
    %52 = arith.addf %50, %51 : vector<8x256xf32>
    %53 = arith.negf %52 : vector<8x256xf32>
    %54 = math.exp %53 : vector<8x256xf32>
    %cst_24 = arith.constant 1.000000e+00 : f32
    %55 = vector.broadcast %cst_24 : f32 to vector<8x256xf32>
    %56 = arith.addf %55, %54 : vector<8x256xf32>
    %57 = arith.divf %55, %56 : vector<8x256xf32>
    %58 = vector.extract_strided_slice %57 {offsets = [0, 0], sizes = [8, 128], strides = [1, 1]} : vector<8x256xf32> to vector<8x128xf32>
    %59 = vector.extract_strided_slice %57 {offsets = [0, 128], sizes = [8, 128], strides = [1, 1]} : vector<8x256xf32> to vector<8x128xf32>
    %60 = vector.extract_strided_slice %44 {offsets = [0, 256], sizes = [8, 128], strides = [1, 1]} : vector<8x384xf32> to vector<8x128xf32>
    %61 = arith.mulf %58, %49 : vector<8x128xf32>
    %62 = arith.addf %60, %61 : vector<8x128xf32>
    %63 = math.tanh %62 : vector<8x128xf32>
    %cst_25 = arith.constant 1.000000e+00 : f32
    %64 = vector.broadcast %cst_25 : f32 to vector<8x128xf32>
    %65 = arith.subf %64, %59 : vector<8x128xf32>
    %66 = arith.mulf %65, %63 : vector<8x128xf32>
    %67 = arith.mulf %59, %37 : vector<8x128xf32>
    %68 = arith.addf %66, %67 : vector<8x128xf32>
    %69 = arith.index_cast %c1_i32 : i32 to index
    %c0_26 = arith.constant 0 : index
    %c0_27 = arith.constant 0 : index
    %70 = vector.load %arg6[%69, %c0_26, %c0_27] : memref<8x8x128xf32, #tpu.memory_space<vmem>>, vector<1x8x128xf32>
    %71 = vector.shape_cast %70 : vector<1x8x128xf32> to vector<8x128xf32>
    %72 = vector.shape_cast %68 : vector<8x128xf32> to vector<1x8x128xf32>
    tpu.vector_store %arg6[%69, %c0_26, %c0_27], %72 {strides = array<i32>} : memref<8x8x128xf32, #tpu.memory_space<vmem>>, vector<1x8x128xf32>,
    %c2_i32 = arith.constant 2 : i32
    %73 = arith.index_cast %c2_i32 : i32 to index
    %c0_28 = arith.constant 0 : index
    %c0_29 = arith.constant 0 : index
    %74 = vector.load %arg7[%73, %c0_28, %c0_29] : memref<8x8x384xf32, #tpu.memory_space<vmem>>, vector<1x8x384xf32>
    %75 = vector.shape_cast %74 : vector<1x8x384xf32> to vector<8x384xf32>
    %76 = arith.truncf %68 : vector<8x128xf32> to vector<8x128xbf16>
    %cst_30 = arith.constant dense<0.000000e+00> : vector<8x384xf32>
    %77 = tpu.matmul %76, %8, %cst_30 {dimension_numbers = #tpu.dot_dimension_numbers<[1], [0], [0], [1], [0, 0, 1, 1], [], []>} : vector<8x128xbf16>, vector<128x384xbf16>, vector<8x384xf32> -> vector<8x384xf32>
    %78 = vector.extract_strided_slice %77 {offsets = [0, 256], sizes = [8, 128], strides = [1, 1]} : vector<8x384xf32> to vector<8x128xf32>
    %79 = vector.broadcast %9 : vector<1x128xf32> to vector<8x128xf32>
    %80 = arith.addf %78, %79 : vector<8x128xf32>
    %81 = vector.extract_strided_slice %75 {offsets = [0, 0], sizes = [8, 256], strides = [1, 1]} : vector<8x384xf32> to vector<8x256xf32>
    %82 = vector.extract_strided_slice %77 {offsets = [0, 0], sizes = [8, 256], strides = [1, 1]} : vector<8x384xf32> to vector<8x256xf32>
    %83 = arith.addf %81, %82 : vector<8x256xf32>
    %84 = arith.negf %83 : vector<8x256xf32>
    %85 = math.exp %84 : vector<8x256xf32>
    %cst_31 = arith.constant 1.000000e+00 : f32
    %86 = vector.broadcast %cst_31 : f32 to vector<8x256xf32>
    %87 = arith.addf %86, %85 : vector<8x256xf32>
    %88 = arith.divf %86, %87 : vector<8x256xf32>
    %89 = vector.extract_strided_slice %88 {offsets = [0, 0], sizes = [8, 128], strides = [1, 1]} : vector<8x256xf32> to vector<8x128xf32>
    %90 = vector.extract_strided_slice %88 {offsets = [0, 128], sizes = [8, 128], strides = [1, 1]} : vector<8x256xf32> to vector<8x128xf32>
    %91 = vector.extract_strided_slice %75 {offsets = [0, 256], sizes = [8, 128], strides = [1, 1]} : vector<8x384xf32> to vector<8x128xf32>
    %92 = arith.mulf %89, %80 : vector<8x128xf32>
    %93 = arith.addf %91, %92 : vector<8x128xf32>
    %94 = math.tanh %93 : vector<8x128xf32>
    %cst_32 = arith.constant 1.000000e+00 : f32
    %95 = vector.broadcast %cst_32 : f32 to vector<8x128xf32>
    %96 = arith.subf %95, %90 : vector<8x128xf32>
    %97 = arith.mulf %96, %94 : vector<8x128xf32>
    %98 = arith.mulf %90, %68 : vector<8x128xf32>
    %99 = arith.addf %97, %98 : vector<8x128xf32>
    %100 = arith.index_cast %c2_i32 : i32 to index
    %c0_33 = arith.constant 0 : index
    %c0_34 = arith.constant 0 : index
    %101 = vector.load %arg6[%100, %c0_33, %c0_34] : memref<8x8x128xf32, #tpu.memory_space<vmem>>, vector<1x8x128xf32>
    %102 = vector.shape_cast %101 : vector<1x8x128xf32> to vector<8x128xf32>
    %103 = vector.shape_cast %99 : vector<8x128xf32> to vector<1x8x128xf32>
    tpu.vector_store %arg6[%100, %c0_33, %c0_34], %103 {strides = array<i32>} : memref<8x8x128xf32, #tpu.memory_space<vmem>>, vector<1x8x128xf32>,
    %c3_i32 = arith.constant 3 : i32
    %104 = arith.index_cast %c3_i32 : i32 to index
    %c0_35 = arith.constant 0 : index
    %c0_36 = arith.constant 0 : index
    %105 = vector.load %arg7[%104, %c0_35, %c0_36] : memref<8x8x384xf32, #tpu.memory_space<vmem>>, vector<1x8x384xf32>
    %106 = vector.shape_cast %105 : vector<1x8x384xf32> to vector<8x384xf32>
    %107 = arith.truncf %99 : vector<8x128xf32> to vector<8x128xbf16>
    %cst_37 = arith.constant dense<0.000000e+00> : vector<8x384xf32>
    %108 = tpu.matmul %107, %8, %cst_37 {dimension_numbers = #tpu.dot_dimension_numbers<[1], [0], [0], [1], [0, 0, 1, 1], [], []>} : vector<8x128xbf16>, vector<128x384xbf16>, vector<8x384xf32> -> vector<8x384xf32>
    %109 = vector.extract_strided_slice %108 {offsets = [0, 256], sizes = [8, 128], strides = [1, 1]} : vector<8x384xf32> to vector<8x128xf32>
    %110 = vector.broadcast %9 : vector<1x128xf32> to vector<8x128xf32>
    %111 = arith.addf %109, %110 : vector<8x128xf32>
    %112 = vector.extract_strided_slice %106 {offsets = [0, 0], sizes = [8, 256], strides = [1, 1]} : vector<8x384xf32> to vector<8x256xf32>
    %113 = vector.extract_strided_slice %108 {offsets = [0, 0], sizes = [8, 256], strides = [1, 1]} : vector<8x384xf32> to vector<8x256xf32>
    %114 = arith.addf %112, %113 : vector<8x256xf32>
    %115 = arith.negf %114 : vector<8x256xf32>
    %116 = math.exp %115 : vector<8x256xf32>
    %cst_38 = arith.constant 1.000000e+00 : f32
    %117 = vector.broadcast %cst_38 : f32 to vector<8x256xf32>
    %118 = arith.addf %117, %116 : vector<8x256xf32>
    %119 = arith.divf %117, %118 : vector<8x256xf32>
    %120 = vector.extract_strided_slice %119 {offsets = [0, 0], sizes = [8, 128], strides = [1, 1]} : vector<8x256xf32> to vector<8x128xf32>
    %121 = vector.extract_strided_slice %119 {offsets = [0, 128], sizes = [8, 128], strides = [1, 1]} : vector<8x256xf32> to vector<8x128xf32>
    %122 = vector.extract_strided_slice %106 {offsets = [0, 256], sizes = [8, 128], strides = [1, 1]} : vector<8x384xf32> to vector<8x128xf32>
    %123 = arith.mulf %120, %111 : vector<8x128xf32>
    %124 = arith.addf %122, %123 : vector<8x128xf32>
    %125 = math.tanh %124 : vector<8x128xf32>
    %cst_39 = arith.constant 1.000000e+00 : f32
    %126 = vector.broadcast %cst_39 : f32 to vector<8x128xf32>
    %127 = arith.subf %126, %121 : vector<8x128xf32>
    %128 = arith.mulf %127, %125 : vector<8x128xf32>
    %129 = arith.mulf %121, %99 : vector<8x128xf32>
    %130 = arith.addf %128, %129 : vector<8x128xf32>
    %131 = arith.index_cast %c3_i32 : i32 to index
    %c0_40 = arith.constant 0 : index
    %c0_41 = arith.constant 0 : index
    %132 = vector.load %arg6[%131, %c0_40, %c0_41] : memref<8x8x128xf32, #tpu.memory_space<vmem>>, vector<1x8x128xf32>
    %133 = vector.shape_cast %132 : vector<1x8x128xf32> to vector<8x128xf32>
    %134 = vector.shape_cast %130 : vector<8x128xf32> to vector<1x8x128xf32>
    tpu.vector_store %arg6[%131, %c0_40, %c0_41], %134 {strides = array<i32>} : memref<8x8x128xf32, #tpu.memory_space<vmem>>, vector<1x8x128xf32>,
    %c4_i32 = arith.constant 4 : i32
    %135 = arith.index_cast %c4_i32 : i32 to index
    %c0_42 = arith.constant 0 : index
    %c0_43 = arith.constant 0 : index
    %136 = vector.load %arg7[%135, %c0_42, %c0_43] : memref<8x8x384xf32, #tpu.memory_space<vmem>>, vector<1x8x384xf32>
    %137 = vector.shape_cast %136 : vector<1x8x384xf32> to vector<8x384xf32>
    %138 = arith.truncf %130 : vector<8x128xf32> to vector<8x128xbf16>
    %cst_44 = arith.constant dense<0.000000e+00> : vector<8x384xf32>
    %139 = tpu.matmul %138, %8, %cst_44 {dimension_numbers = #tpu.dot_dimension_numbers<[1], [0], [0], [1], [0, 0, 1, 1], [], []>} : vector<8x128xbf16>, vector<128x384xbf16>, vector<8x384xf32> -> vector<8x384xf32>
    %140 = vector.extract_strided_slice %139 {offsets = [0, 256], sizes = [8, 128], strides = [1, 1]} : vector<8x384xf32> to vector<8x128xf32>
    %141 = vector.broadcast %9 : vector<1x128xf32> to vector<8x128xf32>
    %142 = arith.addf %140, %141 : vector<8x128xf32>
    %143 = vector.extract_strided_slice %137 {offsets = [0, 0], sizes = [8, 256], strides = [1, 1]} : vector<8x384xf32> to vector<8x256xf32>
    %144 = vector.extract_strided_slice %139 {offsets = [0, 0], sizes = [8, 256], strides = [1, 1]} : vector<8x384xf32> to vector<8x256xf32>
    %145 = arith.addf %143, %144 : vector<8x256xf32>
    %146 = arith.negf %145 : vector<8x256xf32>
    %147 = math.exp %146 : vector<8x256xf32>
    %cst_45 = arith.constant 1.000000e+00 : f32
    %148 = vector.broadcast %cst_45 : f32 to vector<8x256xf32>
    %149 = arith.addf %148, %147 : vector<8x256xf32>
    %150 = arith.divf %148, %149 : vector<8x256xf32>
    %151 = vector.extract_strided_slice %150 {offsets = [0, 0], sizes = [8, 128], strides = [1, 1]} : vector<8x256xf32> to vector<8x128xf32>
    %152 = vector.extract_strided_slice %150 {offsets = [0, 128], sizes = [8, 128], strides = [1, 1]} : vector<8x256xf32> to vector<8x128xf32>
    %153 = vector.extract_strided_slice %137 {offsets = [0, 256], sizes = [8, 128], strides = [1, 1]} : vector<8x384xf32> to vector<8x128xf32>
    %154 = arith.mulf %151, %142 : vector<8x128xf32>
    %155 = arith.addf %153, %154 : vector<8x128xf32>
    %156 = math.tanh %155 : vector<8x128xf32>
    %cst_46 = arith.constant 1.000000e+00 : f32
    %157 = vector.broadcast %cst_46 : f32 to vector<8x128xf32>
    %158 = arith.subf %157, %152 : vector<8x128xf32>
    %159 = arith.mulf %158, %156 : vector<8x128xf32>
    %160 = arith.mulf %152, %130 : vector<8x128xf32>
    %161 = arith.addf %159, %160 : vector<8x128xf32>
    %162 = arith.index_cast %c4_i32 : i32 to index
    %c0_47 = arith.constant 0 : index
    %c0_48 = arith.constant 0 : index
    %163 = vector.load %arg6[%162, %c0_47, %c0_48] : memref<8x8x128xf32, #tpu.memory_space<vmem>>, vector<1x8x128xf32>
    %164 = vector.shape_cast %163 : vector<1x8x128xf32> to vector<8x128xf32>
    %165 = vector.shape_cast %161 : vector<8x128xf32> to vector<1x8x128xf32>
    tpu.vector_store %arg6[%162, %c0_47, %c0_48], %165 {strides = array<i32>} : memref<8x8x128xf32, #tpu.memory_space<vmem>>, vector<1x8x128xf32>,
    %c5_i32 = arith.constant 5 : i32
    %166 = arith.index_cast %c5_i32 : i32 to index
    %c0_49 = arith.constant 0 : index
    %c0_50 = arith.constant 0 : index
    %167 = vector.load %arg7[%166, %c0_49, %c0_50] : memref<8x8x384xf32, #tpu.memory_space<vmem>>, vector<1x8x384xf32>
    %168 = vector.shape_cast %167 : vector<1x8x384xf32> to vector<8x384xf32>
    %169 = arith.truncf %161 : vector<8x128xf32> to vector<8x128xbf16>
    %cst_51 = arith.constant dense<0.000000e+00> : vector<8x384xf32>
    %170 = tpu.matmul %169, %8, %cst_51 {dimension_numbers = #tpu.dot_dimension_numbers<[1], [0], [0], [1], [0, 0, 1, 1], [], []>} : vector<8x128xbf16>, vector<128x384xbf16>, vector<8x384xf32> -> vector<8x384xf32>
    %171 = vector.extract_strided_slice %170 {offsets = [0, 256], sizes = [8, 128], strides = [1, 1]} : vector<8x384xf32> to vector<8x128xf32>
    %172 = vector.broadcast %9 : vector<1x128xf32> to vector<8x128xf32>
    %173 = arith.addf %171, %172 : vector<8x128xf32>
    %174 = vector.extract_strided_slice %168 {offsets = [0, 0], sizes = [8, 256], strides = [1, 1]} : vector<8x384xf32> to vector<8x256xf32>
    %175 = vector.extract_strided_slice %170 {offsets = [0, 0], sizes = [8, 256], strides = [1, 1]} : vector<8x384xf32> to vector<8x256xf32>
    %176 = arith.addf %174, %175 : vector<8x256xf32>
    %177 = arith.negf %176 : vector<8x256xf32>
    %178 = math.exp %177 : vector<8x256xf32>
    %cst_52 = arith.constant 1.000000e+00 : f32
    %179 = vector.broadcast %cst_52 : f32 to vector<8x256xf32>
    %180 = arith.addf %179, %178 : vector<8x256xf32>
    %181 = arith.divf %179, %180 : vector<8x256xf32>
    %182 = vector.extract_strided_slice %181 {offsets = [0, 0], sizes = [8, 128], strides = [1, 1]} : vector<8x256xf32> to vector<8x128xf32>
    %183 = vector.extract_strided_slice %181 {offsets = [0, 128], sizes = [8, 128], strides = [1, 1]} : vector<8x256xf32> to vector<8x128xf32>
    %184 = vector.extract_strided_slice %168 {offsets = [0, 256], sizes = [8, 128], strides = [1, 1]} : vector<8x384xf32> to vector<8x128xf32>
    %185 = arith.mulf %182, %173 : vector<8x128xf32>
    %186 = arith.addf %184, %185 : vector<8x128xf32>
    %187 = math.tanh %186 : vector<8x128xf32>
    %cst_53 = arith.constant 1.000000e+00 : f32
    %188 = vector.broadcast %cst_53 : f32 to vector<8x128xf32>
    %189 = arith.subf %188, %183 : vector<8x128xf32>
    %190 = arith.mulf %189, %187 : vector<8x128xf32>
    %191 = arith.mulf %183, %161 : vector<8x128xf32>
    %192 = arith.addf %190, %191 : vector<8x128xf32>
    %193 = arith.index_cast %c5_i32 : i32 to index
    %c0_54 = arith.constant 0 : index
    %c0_55 = arith.constant 0 : index
    %194 = vector.load %arg6[%193, %c0_54, %c0_55] : memref<8x8x128xf32, #tpu.memory_space<vmem>>, vector<1x8x128xf32>
    %195 = vector.shape_cast %194 : vector<1x8x128xf32> to vector<8x128xf32>
    %196 = vector.shape_cast %192 : vector<8x128xf32> to vector<1x8x128xf32>
    tpu.vector_store %arg6[%193, %c0_54, %c0_55], %196 {strides = array<i32>} : memref<8x8x128xf32, #tpu.memory_space<vmem>>, vector<1x8x128xf32>,
    %c6_i32 = arith.constant 6 : i32
    %197 = arith.index_cast %c6_i32 : i32 to index
    %c0_56 = arith.constant 0 : index
    %c0_57 = arith.constant 0 : index
    %198 = vector.load %arg7[%197, %c0_56, %c0_57] : memref<8x8x384xf32, #tpu.memory_space<vmem>>, vector<1x8x384xf32>
    %199 = vector.shape_cast %198 : vector<1x8x384xf32> to vector<8x384xf32>
    %200 = arith.truncf %192 : vector<8x128xf32> to vector<8x128xbf16>
    %cst_58 = arith.constant dense<0.000000e+00> : vector<8x384xf32>
    %201 = tpu.matmul %200, %8, %cst_58 {dimension_numbers = #tpu.dot_dimension_numbers<[1], [0], [0], [1], [0, 0, 1, 1], [], []>} : vector<8x128xbf16>, vector<128x384xbf16>, vector<8x384xf32> -> vector<8x384xf32>
    %202 = vector.extract_strided_slice %201 {offsets = [0, 256], sizes = [8, 128], strides = [1, 1]} : vector<8x384xf32> to vector<8x128xf32>
    %203 = vector.broadcast %9 : vector<1x128xf32> to vector<8x128xf32>
    %204 = arith.addf %202, %203 : vector<8x128xf32>
    %205 = vector.extract_strided_slice %199 {offsets = [0, 0], sizes = [8, 256], strides = [1, 1]} : vector<8x384xf32> to vector<8x256xf32>
    %206 = vector.extract_strided_slice %201 {offsets = [0, 0], sizes = [8, 256], strides = [1, 1]} : vector<8x384xf32> to vector<8x256xf32>
    %207 = arith.addf %205, %206 : vector<8x256xf32>
    %208 = arith.negf %207 : vector<8x256xf32>
    %209 = math.exp %208 : vector<8x256xf32>
    %cst_59 = arith.constant 1.000000e+00 : f32
    %210 = vector.broadcast %cst_59 : f32 to vector<8x256xf32>
    %211 = arith.addf %210, %209 : vector<8x256xf32>
    %212 = arith.divf %210, %211 : vector<8x256xf32>
    %213 = vector.extract_strided_slice %212 {offsets = [0, 0], sizes = [8, 128], strides = [1, 1]} : vector<8x256xf32> to vector<8x128xf32>
    %214 = vector.extract_strided_slice %212 {offsets = [0, 128], sizes = [8, 128], strides = [1, 1]} : vector<8x256xf32> to vector<8x128xf32>
    %215 = vector.extract_strided_slice %199 {offsets = [0, 256], sizes = [8, 128], strides = [1, 1]} : vector<8x384xf32> to vector<8x128xf32>
    %216 = arith.mulf %213, %204 : vector<8x128xf32>
    %217 = arith.addf %215, %216 : vector<8x128xf32>
    %218 = math.tanh %217 : vector<8x128xf32>
    %cst_60 = arith.constant 1.000000e+00 : f32
    %219 = vector.broadcast %cst_60 : f32 to vector<8x128xf32>
    %220 = arith.subf %219, %214 : vector<8x128xf32>
    %221 = arith.mulf %220, %218 : vector<8x128xf32>
    %222 = arith.mulf %214, %192 : vector<8x128xf32>
    %223 = arith.addf %221, %222 : vector<8x128xf32>
    %224 = arith.index_cast %c6_i32 : i32 to index
    %c0_61 = arith.constant 0 : index
    %c0_62 = arith.constant 0 : index
    %225 = vector.load %arg6[%224, %c0_61, %c0_62] : memref<8x8x128xf32, #tpu.memory_space<vmem>>, vector<1x8x128xf32>
    %226 = vector.shape_cast %225 : vector<1x8x128xf32> to vector<8x128xf32>
    %227 = vector.shape_cast %223 : vector<8x128xf32> to vector<1x8x128xf32>
    tpu.vector_store %arg6[%224, %c0_61, %c0_62], %227 {strides = array<i32>} : memref<8x8x128xf32, #tpu.memory_space<vmem>>, vector<1x8x128xf32>,
    %c7_i32 = arith.constant 7 : i32
    %228 = arith.index_cast %c7_i32 : i32 to index
    %c0_63 = arith.constant 0 : index
    %c0_64 = arith.constant 0 : index
    %229 = vector.load %arg7[%228, %c0_63, %c0_64] : memref<8x8x384xf32, #tpu.memory_space<vmem>>, vector<1x8x384xf32>
    %230 = vector.shape_cast %229 : vector<1x8x384xf32> to vector<8x384xf32>
    %231 = arith.truncf %223 : vector<8x128xf32> to vector<8x128xbf16>
    %cst_65 = arith.constant dense<0.000000e+00> : vector<8x384xf32>
    %232 = tpu.matmul %231, %8, %cst_65 {dimension_numbers = #tpu.dot_dimension_numbers<[1], [0], [0], [1], [0, 0, 1, 1], [], []>} : vector<8x128xbf16>, vector<128x384xbf16>, vector<8x384xf32> -> vector<8x384xf32>
    %233 = vector.extract_strided_slice %232 {offsets = [0, 256], sizes = [8, 128], strides = [1, 1]} : vector<8x384xf32> to vector<8x128xf32>
    %234 = vector.broadcast %9 : vector<1x128xf32> to vector<8x128xf32>
    %235 = arith.addf %233, %234 : vector<8x128xf32>
    %236 = vector.extract_strided_slice %230 {offsets = [0, 0], sizes = [8, 256], strides = [1, 1]} : vector<8x384xf32> to vector<8x256xf32>
    %237 = vector.extract_strided_slice %232 {offsets = [0, 0], sizes = [8, 256], strides = [1, 1]} : vector<8x384xf32> to vector<8x256xf32>
    %238 = arith.addf %236, %237 : vector<8x256xf32>
    %239 = arith.negf %238 : vector<8x256xf32>
    %240 = math.exp %239 : vector<8x256xf32>
    %cst_66 = arith.constant 1.000000e+00 : f32
    %241 = vector.broadcast %cst_66 : f32 to vector<8x256xf32>
    %242 = arith.addf %241, %240 : vector<8x256xf32>
    %243 = arith.divf %241, %242 : vector<8x256xf32>
    %244 = vector.extract_strided_slice %243 {offsets = [0, 0], sizes = [8, 128], strides = [1, 1]} : vector<8x256xf32> to vector<8x128xf32>
    %245 = vector.extract_strided_slice %243 {offsets = [0, 128], sizes = [8, 128], strides = [1, 1]} : vector<8x256xf32> to vector<8x128xf32>
    %246 = vector.extract_strided_slice %230 {offsets = [0, 256], sizes = [8, 128], strides = [1, 1]} : vector<8x384xf32> to vector<8x128xf32>
    %247 = arith.mulf %244, %235 : vector<8x128xf32>
    %248 = arith.addf %246, %247 : vector<8x128xf32>
    %249 = math.tanh %248 : vector<8x128xf32>
    %cst_67 = arith.constant 1.000000e+00 : f32
    %250 = vector.broadcast %cst_67 : f32 to vector<8x128xf32>
    %251 = arith.subf %250, %245 : vector<8x128xf32>
    %252 = arith.mulf %251, %249 : vector<8x128xf32>
    %253 = arith.mulf %245, %223 : vector<8x128xf32>
    %254 = arith.addf %252, %253 : vector<8x128xf32>
    %255 = arith.index_cast %c7_i32 : i32 to index
    %c0_68 = arith.constant 0 : index
    %c0_69 = arith.constant 0 : index
    %256 = vector.load %arg6[%255, %c0_68, %c0_69] : memref<8x8x128xf32, #tpu.memory_space<vmem>>, vector<1x8x128xf32>
    %257 = vector.shape_cast %256 : vector<1x8x128xf32> to vector<8x128xf32>
    %258 = vector.shape_cast %254 : vector<8x128xf32> to vector<1x8x128xf32>
    tpu.vector_store %arg6[%255, %c0_68, %c0_69], %258 {strides = array<i32>} : memref<8x8x128xf32, #tpu.memory_space<vmem>>, vector<1x8x128xf32>,
    %c8_i32 = arith.constant 8 : i32
    return
  }
}

</mosaic_0001>

<bundles_post_ra>
// kernel: encoder_forward.1
= control target key start
LH: loop header
LB: loop body
LE: loop exit
PB: predicated region body
PF: predicated region fallthrough
CT: control target
= control target key end

     0   :  { %11 = vsyncpa [#allocation4], 0  ;;  %s2137_s0 = inlined_call_operand.vmem [shape: bf16[64,32], index: 0, kind: input, shape index: {}]   ;;  %s2138_s1 = inlined_call_operand.vmem [shape: f32[8,128], index: 1, kind: input, shape index: {}]   ;;  %s2139_s2 = inlined_call_operand.hbm [shape: bf16[32,384], index: 2, kind: input, shape index: {}]   ;;  %s2140_s3 = inlined_call_operand.vmem [shape: bf16[128,384], index: 3, kind: input, shape index: {}]   ;;  %s2141_s4 = inlined_call_operand.vmem [shape: f32[1,384], index: 4, kind: input, shape index: {}]   ;;  %s2142_s5 = inlined_call_operand.hbm [shape: f32[1,128], index: 5, kind: input, shape index: {}]   ;;  %s2143_s6 = inlined_call_operand.vmem [shape: f32[8,8,128], index: 6, kind: output, shape index: {}]  }
   0x1   :  { %s21_s23 = sshll.u32 %s2139_s2, 4  ;;  %s22_s23 = int_to_ptr.hbm [resolvable:$true] %s21_s23 }
   0x2   :  { %12 = vsyncpa [#allocation6], 0  ;;  %s1518_s24 = smov [#allocation3]   ;;  %s39_s28 = sshll.u32 %s2142_s5, 4  ;;  %s40_s28 = int_to_ptr.hbm [resolvable:$true] %s39_s28 }
   0x3   :  { %s23_s25 = sshll.u32 %s1518_s24, 4  ;;  %s1519_s29 = smov 192   ;;  %s24_s25 = int_to_ptr.vmem [resolvable:$true] %s23_s25 }
   0x4   :  { %s1520_s30 = smov 12   ;;  %s1521_s7 = smov [#allocation5]  }
   0x5   :  { %29 = dma.hbm_to_vmem [thread:$0]  %s22_s23, 768, %s24_s25, [#allocation4], %s1519_s29, %s1519_s29, %s1520_s30  }
   0x6   :  { %s41_s8 = sshll.u32 %s1521_s7, 4  ;;  %s42_s8 = int_to_ptr.vmem [resolvable:$true] %s41_s8 }
   0x7   :  { %44 = dma.hbm_to_vmem [thread:$0]  %s40_s28, 16, %s42_s8, [#allocation6]  }
   0x8   :  { %1514 = dma.done.wait [#allocation4], 768  }
   0x9   :  { %1515 = vsyncadd [#allocation4], 4294966528 }
   0xa   :  { %1516 = dma.done.wait [#allocation6], 16  }
   0xb   :  { %1517 = vsyncadd [#allocation6], 4294967280  ;;  %v1205_v0 = vld [vmem:[#allocation3 + $0x18] sm:$0xf]  ;;  %v1354_v1 = vld [vmem:[#allocation3 + $0x20] sm:$0xf0] }
   0xc   :  { %v1313_v2 = vld [vmem:[%s2140_s3 + $0xa8] sm:$0xf]  ;;  %v1206_v3 = vor.u32 %v1354_v1, %v1205_v0  ;;  %v1378_v4 = vld [vmem:[%s2140_s3 + $0xb0] sm:$0xf0]  ;;  %v1193_v5 = vld [vmem:[#allocation3] sm:$0xf] }
   0xd   :  { %v1351_v6 = vld [vmem:[#allocation3 + $0x8] sm:$0xf0]  ;;  %v1569_v7 = vor.u32 %v1378_v4, %v1313_v2  ;;  %v1301_v8 = vld [vmem:[%s2140_s3 + $0x90] sm:$0xf]  ;;  %v1375_v9 = vld [vmem:[%s2140_s3 + $0x98] sm:$0xf0] }
   0xe   :  { %149 = vmatpush.bf16.msra.mxu0 %v1206_v3  ;;  %v1194_v10 = vor.u32 %v1351_v6, %v1193_v5  ;;  %v1578_v11 = vor.u32 %v1375_v9, %v1301_v8  ;;  %v1289_v12 = vld [vmem:[%s2140_s3 + $0x78] sm:$0xf]  ;;  %v1372_v13 = vld [vmem:[%s2140_s3 + $0x80] sm:$0xf0]  ;;  %v1321_v14 = vld [vmem:[%s2140_s3 + $0xb0] sm:$0xf] }
   0xf   :  { %420 = vmatpush.bf16.msra.mxu3 %v1569_v7  ;;  %v1592_v15 = vld [vmem:[%s2137_s0] sm:$0xff]  ;;  %v1379_v16 = vld [vmem:[%s2140_s3 + $0xb8] sm:$0xf0]  ;;  %vm130_vm0 = vcmask 261120   ;;  %v1600_v18 = vor.u32 %v1372_v13, %v1289_v12  ;;  %v1309_v19 = vld [vmem:[%s2140_s3 + $0x98] sm:$0xf] }
  0x10   :  { %v1597_v17 = vor.u32 %v1379_v16, %v1321_v14  ;;  %v1277_v20 = vld [vmem:[%s2140_s3 + $0x60] sm:$0xf]  ;;  %v1369_v21 = vld [vmem:[%s2140_s3 + $0x68] sm:$0xf0]  ;;  %v1376_v22 = vld [vmem:[%s2140_s3 + $0xa0] sm:$0xf0] }
  0x11   :  { %v1617_v23 = vor.u32 %v1376_v22, %v1309_v19  ;;  %v1297_v24 = vld [vmem:[%s2140_s3 + $0x80] sm:$0xf]  ;;  %v1373_v25 = vld [vmem:[%s2140_s3 + $0x88] sm:$0xf0]  ;;  %v1626_v26 = vor.u32 %v1369_v21, %v1277_v20  ;;  %v1265_v27 = vld [vmem:[%s2140_s3 + $0x48] sm:$0xf] }
  0x12   :  { %150 = vmatpush.bf16.msra.mxu0 %v1194_v10  ;;  %v1366_v28 = vld [vmem:[%s2140_s3 + $0x50] sm:$0xf0]  ;;  %v1635_v29 = vor.u32 %v1373_v25, %v1297_v24  ;;  %v1253_v31 = vld [vmem:[%s2140_s3 + $0x30] sm:$0xf]  ;;  %v1363_v32 = vld [vmem:[%s2140_s3 + $0x38] sm:$0xf0] }
  0x13   :  { %421 = vmatpush.bf16.msra.mxu3 %v1578_v11  ;;  %v1638_v30 = vor.u32 %v1366_v28, %v1265_v27  ;;  %v1285_v33 = vld [vmem:[%s2140_s3 + $0x68] sm:$0xf]  ;;  %v1370_v34 = vld [vmem:[%s2140_s3 + $0x70] sm:$0xf0]  ;;  %v1353_v35 = vld [vmem:[#allocation3 + $0x1c] sm:$0xf]  ;;  %v1656_v39 = vor.u32 %v1363_v32, %v1253_v31 }
  0x14   :  { %v1653_v36 = vor.u32 %v1370_v34, %v1285_v33  ;;  %v1207_v37 = vld [vmem:[#allocation3 + $0x24] sm:$0xf0]  ;;  %v1241_v40 = vld [vmem:[%s2140_s3 + $0x18] sm:$0xf]  ;;  %v1360_v41 = vld [vmem:[%s2140_s3 + $0x20] sm:$0xf0] }
  0x15   :  { %1215 = vmatmul.msk.bf16.vlgmr.msra.gmra.mxu0 %vm130_vm0, %v1592_v15  ;;  %v1210_v38 = vor.u32 %v1353_v35, %v1207_v37  ;;  %v1350_v42 = vld [vmem:[#allocation3 + $0x4] sm:$0xf]  ;;  %v1195_v43 = vld [vmem:[#allocation3 + $0xc] sm:$0xf0]  ;;  %v1668_v44 = vld [vmem:[%s2137_s0 + $0x8] sm:$0xff]  ;;  %v1671_v46 = vor.u32 %v1360_v41, %v1241_v40 }
  0x16   :  { %446 = vmatpush.bf16.msrb.mxu0 %v1597_v17  ;;  %v1198_v45 = vor.u32 %v1350_v42, %v1195_v43  ;;  %v1229_v47 = vld [vmem:[%s2140_s3] sm:$0xf]  ;;  %v1357_v48 = vld [vmem:[%s2140_s3 + $0x8] sm:$0xf0]  ;;  %v1273_v49 = vld [vmem:[%s2140_s3 + $0x50] sm:$0xf] }
  0x17   :  { %422 = vmatpush.bf16.msra.mxu3 %v1600_v18  ;;  %178 = vmatpush.bf16.msra.mxu1 %v1210_v38  ;;  %v1367_v50 = vld [vmem:[%s2140_s3 + $0x58] sm:$0xf0]  ;;  %v1377_v51 = vld [vmem:[%s2140_s3 + $0xac] sm:$0xf]  ;;  %v1315_v52 = vld [vmem:[%s2140_s3 + $0xb4] sm:$0xf0]  ;;  %v1697_v54 = vor.u32 %v1357_v48, %v1229_v47 }
  0x18   :  { %v1693_v53 = vor.u32 %v1367_v50, %v1273_v49  ;;  %v1702_v55 = vld [vmem:[%s2138_s1] sm:$0xff]  ;;  %v1705_v56 = vor.u32 %v1377_v51, %v1315_v52  ;;  %v1355_v58 = vld [vmem:[#allocation3 + $0x28] sm:$0xf0]  ;;  %v1261_v59 = vld [vmem:[%s2140_s3 + $0x38] sm:$0xf] }
  0x19   :  { %v1213_v57 = vld [vmem:[#allocation3 + $0x20] sm:$0xf]  ;;  %v1374_v60 = vld [vmem:[%s2140_s3 + $0x94] sm:$0xf]  ;;  %v1364_v63 = vld [vmem:[%s2140_s3 + $0x40] sm:$0xf0]  ;;  %v1724_v0 = vpack.c.bf16 %v1702_v55, %v1702_v55 }
  0x1a   :  { %447 = vmatpush.bf16.msrb.mxu0 %v1617_v23  ;;  %v1303_v61 = vld [vmem:[%s2140_s3 + $0x9c] sm:$0xf0]  ;;  %v1214_v62 = vor.u32 %v1355_v58, %v1213_v57  ;;  %v1726_v1 = vor.u32 %v1364_v63, %v1261_v59  ;;  %v1201_v2 = vld [vmem:[#allocation3 + $0x8] sm:$0xf]  ;;  %v1352_v3 = vld [vmem:[#allocation3 + $0x10] sm:$0xf0] }
  0x1b   :  { %423 = vmatpush.bf16.msra.mxu3 %v1626_v26  ;;  %179 = vmatpush.bf16.msra.mxu1 %v1198_v45  ;;  %v1249_v4 = vld [vmem:[%s2140_s3 + $0x20] sm:$0xf]  ;;  %v1733_v5 = vor.u32 %v1374_v60, %v1303_v61  ;;  %v1371_v6 = vld [vmem:[%s2140_s3 + $0x7c] sm:$0xf]  ;;  %v1202_v8 = vor.u32 %v1352_v3, %v1201_v2  ;;  %v1361_v9 = vld [vmem:[%s2140_s3 + $0x28] sm:$0xf0] }
  0x1c   :  { %207 = vmatpush.bf16.msra.mxu2 %v1214_v62  ;;  %v1291_v10 = vld [vmem:[%s2140_s3 + $0x84] sm:$0xf0]  ;;  %v1745_v12 = vor.u32 %v1361_v9, %v1249_v4  ;;  %v1358_v14 = vld [vmem:[%s2140_s3 + $0x10] sm:$0xf0]  ;;  %v1368_v21 = vld [vmem:[%s2140_s3 + $0x64] sm:$0xf] }
  0x1d   :  { %v1237_v13 = vld [vmem:[%s2140_s3 + $0x8] sm:$0xf]  ;;  %v1756_v16 = vor.u32 %v1371_v6, %v1291_v10  ;;  %v1348_v20 = vld [vmem:[%s2137_s0 + $0x10] sm:$0xff]  ;;  %v1365_v25 = vld [vmem:[%s2140_s3 + $0x4c] sm:$0xf] }
  0x1e   :  { %448 = vmatpush.bf16.msrb.mxu0 %v1635_v29  ;;  %1219 = vmatmul.msk.bf16.vlgmr.msra.gmra.mxu1 %vm130_vm0, %v1592_v15  ;;  %v1759_v19 = vor.u32 %v1358_v14, %v1237_v13  ;;  %v1279_v22 = vld [vmem:[%s2140_s3 + $0x6c] sm:$0xf0]  ;;  %v1267_v27 = vld [vmem:[%s2140_s3 + $0x54] sm:$0xf0]  ;;  %v1362_v28 = vld [vmem:[%s2140_s3 + $0x34] sm:$0xf] }
  0x1f   :  { %424 = vmatpush.bf16.msra.mxu3 %v1638_v30  ;;  %516 = vmatpush.bf16.msrb.mxu1 %v1569_v7  ;;  %v1775_v24 = vor.u32 %v1368_v21, %v1279_v22  ;;  %v1255_v31 = vld [vmem:[%s2140_s3 + $0x3c] sm:$0xf0]  ;;  %v1359_v33 = vld [vmem:[%s2140_s3 + $0x1c] sm:$0xf]  ;;  %v1243_v34 = vld [vmem:[%s2140_s3 + $0x24] sm:$0xf0] }
  0x20   :  { %208 = vmatpush.bf16.msra.mxu2 %v1202_v8  ;;  %v1803_v32 = vor.u32 %v1362_v28, %v1255_v31  ;;  %v1815_v35 = vor.u32 %v1359_v33, %v1243_v34  ;;  %v1349_v37 = vld [vmem:[%s2137_s0 + $0x18] sm:$0xff]  ;;  %v1356_v38 = vld [vmem:[%s2140_s3 + $0x4] sm:$0xf]  ;;  %v1231_v40 = vld [vmem:[%s2140_s3 + $0xc] sm:$0xf0] }
  0x21   :  { %v1833_v41 = vor.u32 %v1356_v38, %v1231_v40  ;;  %v70_v43 = vld [vmem:[%s2141_s4] sm:$0x7] }
  0x22   :  { %449 = vmatpush.bf16.msrb.mxu0 %v1653_v36  ;;  %v1904_v8 = vperm.slane %v70_v43, 1 }
  0x23   :  { %425 = vmatpush.bf16.msra.mxu3 %v1656_v39  ;;  %517 = vmatpush.bf16.msrb.mxu1 %v1578_v11 }
  0x24   :  { %529 = vmatpush.bf16.msrb.mxu2 %v1705_v56 }
  0x25   :  { %1216 = vmatmul.msk.bf16.gmra.mxu0 %vm130_vm0, %v1668_v44  ;;  %1223 = vmatmul.msk.bf16.vlgmr.msra.gmra.mxu2 %vm130_vm0, %v1592_v15  ;;  %v1789_v15 = vor.u32 %v1365_v25, %v1267_v27 }
  0x26   :  { %450 = vmatpush.bf16.msrb.mxu0 %v1693_v53 }
  0x27   :  { %426 = vmatpush.bf16.msra.mxu3 %v1671_v46  ;;  %518 = vmatpush.bf16.msrb.mxu1 %v1600_v18 }
  0x28   :  { %530 = vmatpush.bf16.msrb.mxu2 %v1733_v5 }
  0x2a   :  { %451 = vmatpush.bf16.msrb.mxu0 %v1726_v1 }
  0x2b   :  { %427 = vmatpush.bf16.msra.mxu3 %v1697_v54  ;;  %519 = vmatpush.bf16.msrb.mxu1 %v1626_v26 }
  0x2c   :  { %531 = vmatpush.bf16.msrb.mxu2 %v1756_v16 }
  0x2e   :  { %428 = vmatmul.bf16.vlgmr.msra.gmra.mxu3 %v1724_v0  ;;  %452 = vmatpush.bf16.msrb.mxu0 %v1745_v12 }
  0x2f   :  { %433 = vmatpush.bf16.msrb.mxu3 %v1705_v56  ;;  %520 = vmatpush.bf16.msrb.mxu1 %v1638_v30 }
  0x30   :  { %1220 = vmatmul.msk.bf16.gmra.mxu1 %vm130_vm0, %v1668_v44  ;;  %532 = vmatpush.bf16.msrb.mxu2 %v1775_v24 }
  0x32   :  { %453 = vmatpush.bf16.msrb.mxu0 %v1759_v19 }
  0x33   :  { %434 = vmatpush.bf16.msrb.mxu3 %v1733_v5  ;;  %521 = vmatpush.bf16.msrb.mxu1 %v1656_v39 }
  0x34   :  { %533 = vmatpush.bf16.msrb.mxu2 %v1789_v15 }
  0x35   :  { %1217 = vmatmul.msk.bf16.gmra.mxu0 %vm130_vm0, %v1348_v20  ;;  %1224 = vmatmul.msk.bf16.gmra.mxu2 %vm130_vm0, %v1668_v44  ;;  %v72_v44 = vperm.slane %v70_v43, 0 }
  0x36   :  { %610 = vmatpush.bf16.msra.mxu0 %v1569_v7 }
  0x37   :  { %435 = vmatpush.bf16.msrb.mxu3 %v1756_v16  ;;  %522 = vmatpush.bf16.msrb.mxu1 %v1671_v46 }
  0x38   :  { %534 = vmatpush.bf16.msrb.mxu2 %v1803_v32 }
  0x3a   :  { %611 = vmatpush.bf16.msra.mxu0 %v1578_v11 }
  0x3b   :  { %436 = vmatpush.bf16.msrb.mxu3 %v1775_v24  ;;  %523 = vmatpush.bf16.msrb.mxu1 %v1697_v54 }
  0x3c   :  { %535 = vmatpush.bf16.msrb.mxu2 %v1815_v35 }
  0x3e   :  { %612 = vmatpush.bf16.msra.mxu0 %v1600_v18 }
  0x3f   :  { %437 = vmatpush.bf16.msrb.mxu3 %v1789_v15  ;;  %623 = vmatpush.bf16.msra.mxu1 %v1705_v56 }
  0x40   :  { %1221 = vmatmul.msk.bf16.gmra.mxu1 %vm130_vm0, %v1348_v20  ;;  %536 = vmatpush.bf16.msrb.mxu2 %v1833_v41 }
  0x42   :  { %613 = vmatpush.bf16.msra.mxu0 %v1626_v26 }
  0x43   :  { %438 = vmatpush.bf16.msrb.mxu3 %v1803_v32  ;;  %624 = vmatpush.bf16.msra.mxu1 %v1733_v5 }
  0x44   :  { %636 = vmatpush.bf16.msra.mxu2 %v1597_v17 }
  0x45   :  { %1218 = vmatmul.msk.bf16.gmra.mxu0 %vm130_vm0, %v1349_v37  ;;  %1225 = vmatmul.msk.bf16.gmra.mxu2 %vm130_vm0, %v1348_v20 }
  0x46   :  { %614 = vmatpush.bf16.msra.mxu0 %v1638_v30 }
  0x47   :  { %439 = vmatpush.bf16.msrb.mxu3 %v1815_v35  ;;  %625 = vmatpush.bf16.msra.mxu1 %v1756_v16 }
  0x48   :  { %637 = vmatpush.bf16.msra.mxu2 %v1617_v23 }
  0x4a   :  { %615 = vmatpush.bf16.msra.mxu0 %v1656_v39 }
  0x4b   :  { %440 = vmatpush.bf16.msrb.mxu3 %v1833_v41  ;;  %626 = vmatpush.bf16.msra.mxu1 %v1775_v24 }
  0x4c   :  { %638 = vmatpush.bf16.msra.mxu2 %v1635_v29 }
  0x4e   :  { %441 = vmatmul.bf16.vlgmr.msrb.gmra.mxu3 %v1724_v0  ;;  %616 = vmatpush.bf16.msra.mxu0 %v1671_v46 }
  0x4f   :  { %542 = vmatpush.bf16.msra.mxu3 %v1597_v17  ;;  %627 = vmatpush.bf16.msra.mxu1 %v1789_v15 }
  0x50   :  { %1222 = vmatmul.msk.bf16.gmra.mxu1 %vm130_vm0, %v1349_v37  ;;  %639 = vmatpush.bf16.msra.mxu2 %v1653_v36 }
  0x52   :  { %617 = vmatpush.bf16.msra.mxu0 %v1697_v54 }
  0x53   :  { %543 = vmatpush.bf16.msra.mxu3 %v1617_v23  ;;  %628 = vmatpush.bf16.msra.mxu1 %v1803_v32 }
  0x54   :  { %640 = vmatpush.bf16.msra.mxu2 %v1693_v53 }
  0x55   :  { %454 = vmatmul.bf16.vlgmr.msrb.gmra.mxu0 %v1724_v0  ;;  %1226 = vmatmul.msk.bf16.gmra.mxu2 %vm130_vm0, %v1349_v37  ;;  %v1909_v37 = vld [vmem:[#allocation5] ss:$0 sm:$0xff] }
  0x56   :  { %717 = vmatpush.bf16.msrb.mxu0 %v1705_v56 }
  0x57   :  { %544 = vmatpush.bf16.msra.mxu3 %v1635_v29  ;;  %629 = vmatpush.bf16.msra.mxu1 %v1815_v35 }
  0x58   :  { %641 = vmatpush.bf16.msra.mxu2 %v1726_v1 }
  0x5a   :  { %718 = vmatpush.bf16.msrb.mxu0 %v1733_v5 }
  0x5b   :  { %545 = vmatpush.bf16.msra.mxu3 %v1653_v36  ;;  %630 = vmatpush.bf16.msra.mxu1 %v1833_v41 }
  0x5c   :  { %642 = vmatpush.bf16.msra.mxu2 %v1745_v12 }
  0x5e   :  { %719 = vmatpush.bf16.msrb.mxu0 %v1756_v16 }
  0x5f   :  { %546 = vmatpush.bf16.msra.mxu3 %v1693_v53 }
  0x60   :  { %643 = vmatpush.bf16.msra.mxu2 %v1759_v19 }
  0x62   :  { %720 = vmatpush.bf16.msrb.mxu0 %v1775_v24 }
  0x63   :  { %547 = vmatpush.bf16.msra.mxu3 %v1726_v1 }
  0x66   :  { %721 = vmatpush.bf16.msrb.mxu0 %v1789_v15 }
  0x67   :  { %548 = vmatpush.bf16.msra.mxu3 %v1745_v12 }
  0x6a   :  { %722 = vmatpush.bf16.msrb.mxu0 %v1803_v32 }
  0x6b   :  { %549 = vmatpush.bf16.msra.mxu3 %v1759_v19 }
  0x6e   :  { %723 = vmatpush.bf16.msrb.mxu0 %v1815_v35 }
  0x6f   :  { %704 = vmatpush.bf16.msrb.mxu3 %v1569_v7 }
  0x72   :  { %724 = vmatpush.bf16.msrb.mxu0 %v1833_v41 }
  0x73   :  { %705 = vmatpush.bf16.msrb.mxu3 %v1578_v11 }
  0x77   :  { %706 = vmatpush.bf16.msrb.mxu3 %v1600_v18 }
  0x7b   :  { %707 = vmatpush.bf16.msrb.mxu3 %v1626_v26 }
  0x7f   :  { %708 = vmatpush.bf16.msrb.mxu3 %v1638_v30 }
  0x83   :  { %709 = vmatpush.bf16.msrb.mxu3 %v1656_v39 }
  0x87   :  { %710 = vmatpush.bf16.msrb.mxu3 %v1671_v46 }
  0x8b   :  { %711 = vmatpush.bf16.msrb.mxu3 %v1697_v54 }
  0x92   :  { %v152_v42 = vpop.f32.mrf.mxu0 }
  0x93   :  { %v153_v52 = vadd.f32 %v152_v42, %v72_v44 }
  0x9a   :  { %v154_v45 = vpop.f32.mrf.mxu0 }
  0x9b   :  { %v1892_v47 = vadd.f32 %v154_v45, %v72_v44  ;;  %v181_v10 = vpop.f32.mrf.mxu1 }
  0x9c   :  { %v182_v14 = vadd.f32 %v181_v10, %v1904_v8 }
  0xa2   :  { %v157_v48 = vpop.f32.mrf.mxu0 }
  0xa3   :  { %v1894_v49 = vadd.f32 %v157_v48, %v72_v44 }
  0xaa   :  { %v159_v50 = vpop.f32.mrf.mxu0 }
  0xab   :  { %v1896_v51 = vadd.f32 %v159_v50, %v72_v44 }
  0xb1   :  { %v429_v57 = vpop.f32.mrf.mxu3 }
  0xb2   :  { %v463_v58 = vadd.f32 %v429_v57, %v153_v52  ;;  %v162_v59 = vpop.f32.mrf.mxu0  ;;  %v1912_v57 = vperm.slane %v70_v43, 2 }
  0xb3   :  { %v1898_v60 = vadd.f32 %v162_v59, %v72_v44  ;;  %v210_v59 = vpop.f32.mrf.mxu2 }
  0xb4   :  { %v1323_v61 = vmul.f32 -1.442695, %v463_v58 }
  0xb6   :  { %1385 = vpow2.f32 %v1323_v61 }
  0xb9   :  { %v431_v62 = vpop.f32.mrf.mxu3 }
  0xba   :  { %v164_v63 = vpop.f32.mrf.mxu0 }
  0xbb   :  { %v1900_v0 = vadd.f32 %v164_v63, %v72_v44  ;;  %v211_v63 = vadd.f32 %v210_v59, %v1912_v57 }
  0xbc   :  { %v1386_v2 = vpop.eup %1385 }
  0xbd   :  { %v471_v3 = vadd.f32 1.0, %v1386_v2 }
  0xbf   :  { %1387 = vrcp.f32 %v471_v3  ;;  %v484_v42 = vand.u32 2147483648, %v471_v3  ;;  %vm478_vm2 = vweird.f32 %v471_v3  ;;  %v482_v48 = vand.u32 2147483647, %v471_v3 }
  0xc1   :  { %v485_v58 = vor.u32 1.1754944e-38, %v484_v42  ;;  %vm483_vm4 = vcmp.eq.f32.partialorder %v482_v48, 8.507059e+37 }
  0xc2   :  { %v167_v4 = vpop.f32.mrf.mxu0 }
  0xc3   :  { %v1902_v6 = vadd.f32 %v167_v4, %v72_v44 }
  0xc5   :  { %2144 = vst [vmem:[#allocation9_spill] sm:$0xff] %v1902_v6  ;;  %v1388_v9 = vpop.eup %1387 }
  0xc6   :  { %v474_v21 = vmul.f32 %v1388_v9, %v471_v3  ;;  %vm479_vm1 = vweird.f32 %v1388_v9 }
  0xc7   :  { %vm480_vm3 = vmor %vm478_vm2, %vm479_vm1 }
  0xc8   :  { %v475_v27 = vsub.f32 1.0, %v474_v21 }
  0xca   :  { %v169_v13 = vpop.f32.mrf.mxu0  ;;  %v476_v33 = vmul.f32 %v1388_v9, %v475_v27 }
  0xcb   :  { %v1907_v20 = vadd.f32 %v169_v13, %v72_v44 }
  0xcc   :  { %v477_v38 = vadd.f32 %v1388_v9, %v476_v33 }
  0xcd   :  { %2145 = vst [vmem:[#allocation10_spill] sm:$0xff] %v1907_v20 }
  0xce   :  { %v481_v52 = vsel %vm480_vm3, %v1388_v9, %v477_v38 }
  0xcf   :  { %v486_v61 = vsel %vm483_vm4, %v485_v58, %v481_v52 }
  0xd1   :  { %v442_v22 = vpop.f32.mrf.mxu3 }
  0xd2   :  { %v464_v25 = vadd.f32 %v442_v22, %v182_v14  ;;  %v455_v31 = vpop.f32.mrf.mxu0 }
  0xd3   :  { %v462_v50 = vadd.f32 %v1909_v37, %v455_v31 }
  0xd4   :  { %v1324_v28 = vmul.f32 -1.442695, %v464_v25 }
  0xd5   :  { %v503_v62 = vmul.f32 %v486_v61, %v462_v50 }
  0xd6   :  { %1389 = vpow2.f32 %v1324_v28 }
  0xd7   :  { %v504_v10 = vadd.f32 %v503_v62, %v211_v63 }
  0xd9   :  { %v444_v34 = vpop.f32.mrf.mxu3 }
  0xda   :  { %v457_v44 = vpop.f32.mrf.mxu0 }
  0xdc   :  { %v1390_v40 = vpop.eup %1389 }
  0xdd   :  { %v472_v45 = vadd.f32 1.0, %v1390_v40  ;;  %v212_v40 = vpop.f32.mrf.mxu2 }
  0xdf   :  { %1391 = vrcp.f32 %v472_v45  ;;  %v499_v3 = vand.u32 2147483648, %v472_v45  ;;  %v497_v21 = vand.u32 2147483647, %v472_v45  ;;  %vm493_vm6 = vweird.f32 %v472_v45 }
  0xe0   :  { %1393 = vtanh.f32 %v504_v10 }
  0xe1   :  { %v500_v43 = vor.u32 1.1754944e-38, %v499_v3  ;;  %vm498_vm8 = vcmp.eq.f32.partialorder %v497_v21, 8.507059e+37 }
  0xe5   :  { %v1392_v2 = vpop.eup %1391 }
  0xe6   :  { %v489_v4 = vmul.f32 %v1392_v2, %v472_v45  ;;  %vm494_vm5 = vweird.f32 %v1392_v2  ;;  %v1394_v28 = vpop.eup %1393  ;;  %v1950_v45 = vpop.f32.mrf.mxu2 }
  0xe7   :  { %vm495_vm7 = vmor %vm493_vm6, %vm494_vm5 }
  0xe8   :  { %v490_v13 = vsub.f32 1.0, %v489_v4 }
  0xea   :  { %v491_v14 = vmul.f32 %v1392_v2, %v490_v13 }
  0xec   :  { %v492_v9 = vadd.f32 %v1392_v2, %v491_v14 }
  0xee   :  { %v496_v22 = vsel %vm495_vm7, %v1392_v2, %v492_v9  ;;  %v1954_v44 = vpop.f32.mrf.mxu2 }
  0xef   :  { %v501_v25 = vsel %vm498_vm8, %v500_v43, %v496_v22 }
  0xf0   :  { %v506_v27 = vsub.f32 1.0, %v501_v25  ;;  %v508_v33 = vmul.f32 %v501_v25, %v1702_v55  ;;  %v183_v55 = vpop.f32.mrf.mxu1 }
  0xf1   :  { %v184_v3 = vadd.f32 %v183_v55, %v1904_v8 }
  0xf2   :  { %v507_v31 = vmul.f32 %v1394_v28, %v506_v27 }
  0xf4   :  { %v1916_v34 = vadd.f32 %v508_v33, %v507_v31 }
  0xf6   :  { %510 = vst [vmem:[%s2143_s6] sm:$0xff] %v1916_v34  ;;  %v515_v38 = vpack.c.bf16 %v1916_v34, %v1916_v34  ;;  %v1958_v52 = vpop.f32.mrf.mxu2 }
  0xf8   :  { %524 = vmatmul.bf16.vlgmr.msrb.gmra.mxu1 %v515_v38  ;;  %537 = vmatmul.bf16.vlgmr.msrb.gmra.mxu2 %v515_v38  ;;  %v1948_v42 = vpop.f32.mrf.mxu1 }
  0xf9   :  { %550 = vmatmul.bf16.vlgmr.msra.gmra.mxu3 %v515_v38  ;;  %730 = vmatpush.bf16.msrb.mxu1 %v1597_v17 }
  0xfa   :  { %798 = vmatpush.bf16.msrb.mxu2 %v1569_v7  ;;  %811 = vmatpush.bf16.msra.mxu3 %v1705_v56 }
  0xfd   :  { %731 = vmatpush.bf16.msrb.mxu1 %v1617_v23 }
  0xfe   :  { %799 = vmatpush.bf16.msrb.mxu2 %v1578_v11  ;;  %812 = vmatpush.bf16.msra.mxu3 %v1733_v5  ;;  %v1962_v59 = vpop.f32.mrf.mxu2 }
 0x100   :  { %v1952_v48 = vpop.f32.mrf.mxu1 }
 0x101   :  { %732 = vmatpush.bf16.msrb.mxu1 %v1635_v29 }
 0x102   :  { %800 = vmatpush.bf16.msrb.mxu2 %v1600_v18  ;;  %813 = vmatpush.bf16.msra.mxu3 %v1756_v16 }
 0x105   :  { %733 = vmatpush.bf16.msrb.mxu1 %v1653_v36 }
 0x106   :  { %801 = vmatpush.bf16.msrb.mxu2 %v1626_v26  ;;  %814 = vmatpush.bf16.msra.mxu3 %v1775_v24  ;;  %v1966_v62 = vpop.f32.mrf.mxu2 }
 0x107   :  { %2146 = vst [vmem:[#allocation11_spill] sm:$0xff] %v1966_v62 }
 0x108   :  { %v1956_v50 = vpop.f32.mrf.mxu1 }
 0x109   :  { %734 = vmatpush.bf16.msrb.mxu1 %v1693_v53 }
 0x10a   :  { %802 = vmatpush.bf16.msrb.mxu2 %v1638_v30  ;;  %815 = vmatpush.bf16.msra.mxu3 %v1789_v15 }
 0x10d   :  { %735 = vmatpush.bf16.msrb.mxu1 %v1726_v1 }
 0x10e   :  { %803 = vmatpush.bf16.msrb.mxu2 %v1656_v39  ;;  %816 = vmatpush.bf16.msra.mxu3 %v1803_v32  ;;  %v1970_v2 = vpop.f32.mrf.mxu2 }
 0x10f   :  { %2148 = vst [vmem:[#allocation13_spill] sm:$0xff] %v1970_v2 }
 0x110   :  { %v1960_v58 = vpop.f32.mrf.mxu1 }
 0x111   :  { %736 = vmatpush.bf16.msrb.mxu1 %v1745_v12 }
 0x112   :  { %804 = vmatpush.bf16.msrb.mxu2 %v1671_v46  ;;  %817 = vmatpush.bf16.msra.mxu3 %v1815_v35 }
 0x115   :  { %737 = vmatpush.bf16.msrb.mxu1 %v1759_v19 }
 0x116   :  { %805 = vmatpush.bf16.msrb.mxu2 %v1697_v54  ;;  %818 = vmatpush.bf16.msra.mxu3 %v1833_v41 }
 0x118   :  { %v1964_v61 = vpop.f32.mrf.mxu1 }
 0x120   :  { %v1968_v63 = vpop.f32.mrf.mxu1 }
 0x121   :  { %2147 = vst [vmem:[#allocation12_spill] sm:$0xff] %v1968_v63 }
 0x175   :  { %v525_v4 = vpop.f32.mrf.mxu1 }
 0x176   :  { %v556_v10 = vadd.f32 %v525_v4, %v1892_v47 }
 0x178   :  { %v1325_v13 = vmul.f32 -1.442695, %v556_v10 }
 0x17a   :  { %1395 = vpow2.f32 %v1325_v13 }
 0x17b   :  { %v538_v14 = vpop.f32.mrf.mxu2 }
 0x17c   :  { %v557_v21 = vadd.f32 %v538_v14, %v184_v3  ;;  %v551_v9 = vpop.f32.mrf.mxu3 }
 0x17d   :  { %v527_v43 = vpop.f32.mrf.mxu1 }
 0x17e   :  { %v1326_v22 = vmul.f32 -1.442695, %v557_v21 }
 0x180   :  { %v1396_v25 = vpop.eup %1395  ;;  %1397 = vpow2.f32 %v1326_v22 }
 0x181   :  { %v564_v27 = vadd.f32 1.0, %v1396_v25  ;;  %v555_v25 = vadd.f32 %v1909_v37, %v551_v9 }
 0x183   :  { %1399 = vrcp.f32 %v564_v27  ;;  %v540_v28 = vpop.f32.mrf.mxu2  ;;  %v577_v10 = vand.u32 2147483648, %v564_v27  ;;  %v575_v13 = vand.u32 2147483647, %v564_v27  ;;  %vm571_vm10 = vweird.f32 %v564_v27 }
 0x184   :  { %v553_v31 = vpop.f32.mrf.mxu3 }
 0x185   :  { %v578_v21 = vor.u32 1.1754944e-38, %v577_v10  ;;  %vm576_vm12 = vcmp.eq.f32.partialorder %v575_v13, 8.507059e+37  ;;  %v213_v31 = vadd.f32 %v212_v40, %v1912_v57 }
 0x186   :  { %v1398_v33 = vpop.eup %1397 }
 0x187   :  { %v565_v38 = vadd.f32 1.0, %v1398_v33 }
 0x189   :  { %v1400_v2 = vpop.eup %1399  ;;  %1401 = vrcp.f32 %v565_v38  ;;  %v590_v63 = vand.u32 2147483647, %v565_v38  ;;  %vm586_vm14 = vweird.f32 %v565_v38 }
 0x18a   :  { %v567_v47 = vmul.f32 %v1400_v2, %v564_v27  ;;  %vm572_vm9 = vweird.f32 %v1400_v2 }
 0x18b   :  { %vm573_vm11 = vmor %vm571_vm10, %vm572_vm9  ;;  %vm591_vm0 = vcmp.eq.f32.partialorder %v590_v63, 8.507059e+37 }
 0x18c   :  { %v568_v4 = vsub.f32 1.0, %v567_v47  ;;  %v592_v47 = vand.u32 2147483648, %v565_v38 }
 0x18e   :  { %v569_v55 = vmul.f32 %v1400_v2, %v568_v4  ;;  %v593_v27 = vor.u32 1.1754944e-38, %v592_v47 }
 0x18f   :  { %v1402_v3 = vpop.eup %1401 }
 0x190   :  { %v582_v14 = vmul.f32 %v1402_v3, %v565_v38  ;;  %v570_v43 = vadd.f32 %v1400_v2, %v569_v55  ;;  %vm587_vm13 = vweird.f32 %v1402_v3 }
 0x191   :  { %vm588_vm15 = vmor %vm586_vm14, %vm587_vm13 }
 0x192   :  { %v583_v22 = vsub.f32 1.0, %v582_v14  ;;  %v574_v28 = vsel %vm573_vm11, %v1400_v2, %v570_v43 }
 0x193   :  { %v579_v33 = vsel %vm576_vm12, %v578_v21, %v574_v28 }
 0x194   :  { %v584_v20 = vmul.f32 %v1402_v3, %v583_v22  ;;  %v596_v4 = vmul.f32 %v579_v33, %v555_v25 }
 0x196   :  { %v585_v62 = vadd.f32 %v1402_v3, %v584_v20  ;;  %v597_v6 = vadd.f32 %v596_v4, %v213_v31 }
 0x198   :  { %v589_v55 = vsel %vm588_vm15, %v1402_v3, %v585_v62  ;;  %1403 = vtanh.f32 %v597_v6  ;;  %v187_v6 = vadd.f32 %v1948_v42, %v1904_v8 }
 0x199   :  { %v594_v10 = vsel %vm591_vm0, %v593_v27, %v589_v55 }
 0x19a   :  { %v599_v9 = vsub.f32 1.0, %v594_v10  ;;  %v601_v40 = vmul.f32 %v594_v10, %v1916_v34 }
 0x19e   :  { %v1404_v2 = vpop.eup %1403 }
 0x19f   :  { %v600_v13 = vmul.f32 %v1404_v2, %v599_v9 }
 0x1a1   :  { %v1977_v14 = vadd.f32 %v601_v40, %v600_v13 }
 0x1a3   :  { %1327 = vst [vmem:[%s2143_s6 + $0x8] sm:$0xff] %v1977_v14  ;;  %v609_v20 = vpack.c.bf16 %v1977_v14, %v1977_v14 }
 0x1a5   :  { %618 = vmatmul.bf16.vlgmr.msra.gmra.mxu0 %v609_v20  ;;  %631 = vmatmul.bf16.vlgmr.msra.gmra.mxu1 %v609_v20 }
 0x1a6   :  { %644 = vmatmul.bf16.vlgmr.msra.gmra.mxu2 %v609_v20  ;;  %824 = vmatpush.bf16.msra.mxu0 %v1597_v17 }
 0x1a7   :  { %892 = vmatpush.bf16.msra.mxu1 %v1569_v7  ;;  %905 = vmatpush.bf16.msra.mxu2 %v1705_v56 }
 0x1aa   :  { %825 = vmatpush.bf16.msra.mxu0 %v1617_v23 }
 0x1ab   :  { %893 = vmatpush.bf16.msra.mxu1 %v1578_v11  ;;  %906 = vmatpush.bf16.msra.mxu2 %v1733_v5 }
 0x1ae   :  { %826 = vmatpush.bf16.msra.mxu0 %v1635_v29 }
 0x1af   :  { %894 = vmatpush.bf16.msra.mxu1 %v1600_v18  ;;  %907 = vmatpush.bf16.msra.mxu2 %v1756_v16 }
 0x1b2   :  { %827 = vmatpush.bf16.msra.mxu0 %v1653_v36 }
 0x1b3   :  { %895 = vmatpush.bf16.msra.mxu1 %v1626_v26  ;;  %908 = vmatpush.bf16.msra.mxu2 %v1775_v24 }
 0x1b6   :  { %828 = vmatpush.bf16.msra.mxu0 %v1693_v53 }
 0x1b7   :  { %896 = vmatpush.bf16.msra.mxu1 %v1638_v30  ;;  %909 = vmatpush.bf16.msra.mxu2 %v1789_v15 }
 0x1ba   :  { %829 = vmatpush.bf16.msra.mxu0 %v1726_v1 }
 0x1bb   :  { %897 = vmatpush.bf16.msra.mxu1 %v1656_v39  ;;  %910 = vmatpush.bf16.msra.mxu2 %v1803_v32 }
 0x1be   :  { %830 = vmatpush.bf16.msra.mxu0 %v1745_v12 }
 0x1bf   :  { %898 = vmatpush.bf16.msra.mxu1 %v1671_v46  ;;  %911 = vmatpush.bf16.msra.mxu2 %v1815_v35 }
 0x1c2   :  { %831 = vmatpush.bf16.msra.mxu0 %v1759_v19 }
 0x1c3   :  { %899 = vmatpush.bf16.msra.mxu1 %v1697_v54  ;;  %912 = vmatpush.bf16.msra.mxu2 %v1833_v41 }
 0x222   :  { %v619_v34 = vpop.f32.mrf.mxu0  ;;  %v632_v62 = vpop.f32.mrf.mxu1 }
 0x223   :  { %v650_v63 = vadd.f32 %v619_v34, %v1894_v49  ;;  %v651_v38 = vadd.f32 %v632_v62, %v187_v6 }
 0x225   :  { %v1328_v3 = vmul.f32 -1.442695, %v650_v63  ;;  %v1329_v43 = vmul.f32 -1.442695, %v651_v38 }
 0x227   :  { %1405 = vpow2.f32 %v1328_v3 }
 0x228   :  { %1407 = vpow2.f32 %v1329_v43  ;;  %v216_v43 = vadd.f32 %v1950_v45, %v1912_v57 }
 0x229   :  { %v645_v21 = vpop.f32.mrf.mxu2 }
 0x22a   :  { %v621_v22 = vpop.f32.mrf.mxu0  ;;  %v634_v25 = vpop.f32.mrf.mxu1  ;;  %v649_v62 = vadd.f32 %v1909_v37, %v645_v21 }
 0x22d   :  { %v1406_v28 = vpop.eup %1405 }
 0x22e   :  { %v1408_v31 = vpop.eup %1407  ;;  %v658_v33 = vadd.f32 1.0, %v1406_v28 }
 0x22f   :  { %v659_v47 = vadd.f32 1.0, %v1408_v31 }
 0x230   :  { %1409 = vrcp.f32 %v658_v33  ;;  %v671_v2 = vand.u32 2147483648, %v658_v33  ;;  %v669_v40 = vand.u32 2147483647, %v658_v33  ;;  %vm665_vm2 = vweird.f32 %v658_v33 }
 0x231   :  { %1411 = vrcp.f32 %v659_v47  ;;  %v647_v4 = vpop.f32.mrf.mxu2  ;;  %v686_v22 = vand.u32 2147483648, %v659_v47  ;;  %vm680_vm6 = vweird.f32 %v659_v47  ;;  %v684_v28 = vand.u32 2147483647, %v659_v47 }
 0x232   :  { %v672_v34 = vor.u32 1.1754944e-38, %v671_v2  ;;  %vm670_vm4 = vcmp.eq.f32.partialorder %v669_v40, 8.507059e+37 }
 0x233   :  { %vm685_vm8 = vcmp.eq.f32.partialorder %v684_v28, 8.507059e+37 }
 0x236   :  { %v1410_v42 = vpop.eup %1409 }
 0x237   :  { %v1412_v27 = vpop.eup %1411  ;;  %v661_v55 = vmul.f32 %v1410_v42, %v658_v33  ;;  %vm666_vm1 = vweird.f32 %v1410_v42  ;;  %v687_v33 = vor.u32 1.1754944e-38, %v686_v22 }
 0x238   :  { %v676_v10 = vmul.f32 %v1412_v27, %v659_v47  ;;  %vm667_vm3 = vmor %vm665_vm2, %vm666_vm1  ;;  %vm681_vm5 = vweird.f32 %v1412_v27 }
 0x239   :  { %v662_v49 = vsub.f32 1.0, %v661_v55  ;;  %vm682_vm7 = vmor %vm680_vm6, %vm681_vm5 }
 0x23a   :  { %v677_v9 = vsub.f32 1.0, %v676_v10 }
 0x23b   :  { %v663_v13 = vmul.f32 %v1410_v42, %v662_v49 }
 0x23c   :  { %v678_v20 = vmul.f32 %v1412_v27, %v677_v9 }
 0x23d   :  { %v664_v6 = vadd.f32 %v1410_v42, %v663_v13 }
 0x23e   :  { %v679_v38 = vadd.f32 %v1412_v27, %v678_v20 }
 0x23f   :  { %v668_v63 = vsel %vm667_vm3, %v1410_v42, %v664_v6 }
 0x240   :  { %v673_v3 = vsel %vm670_vm4, %v672_v34, %v668_v63  ;;  %v683_v4 = vsel %vm682_vm7, %v1412_v27, %v679_v38 }
 0x241   :  { %v690_v25 = vmul.f32 %v673_v3, %v649_v62  ;;  %v688_v55 = vsel %vm685_vm8, %v687_v33, %v683_v4 }
 0x242   :  { %v693_v21 = vsub.f32 1.0, %v688_v55  ;;  %v695_v49 = vmul.f32 %v688_v55, %v1977_v14  ;;  %v189_v14 = vadd.f32 %v1952_v48, %v1904_v8 }
 0x243   :  { %v691_v31 = vadd.f32 %v690_v25, %v216_v43 }
 0x245   :  { %1413 = vtanh.f32 %v691_v31 }
 0x24b   :  { %v1414_v42 = vpop.eup %1413 }
 0x24c   :  { %v694_v10 = vmul.f32 %v1414_v42, %v693_v21 }
 0x24e   :  { %v2016_v9 = vadd.f32 %v695_v49, %v694_v10 }
 0x250   :  { %1330 = vst [vmem:[%s2143_s6 + $0x10] sm:$0xff] %v2016_v9  ;;  %v703_v45 = vpack.c.bf16 %v2016_v9, %v2016_v9 }
 0x252   :  { %712 = vmatmul.bf16.vlgmr.msrb.gmra.mxu3 %v703_v45  ;;  %725 = vmatmul.bf16.vlgmr.msrb.gmra.mxu0 %v703_v45 }
 0x253   :  { %738 = vmatmul.bf16.vlgmr.msrb.gmra.mxu1 %v703_v45  ;;  %918 = vmatpush.bf16.msrb.mxu3 %v1597_v17 }
 0x254   :  { %986 = vmatpush.bf16.msrb.mxu0 %v1569_v7  ;;  %999 = vmatpush.bf16.msrb.mxu1 %v1705_v56 }
 0x257   :  { %919 = vmatpush.bf16.msrb.mxu3 %v1617_v23 }
 0x258   :  { %987 = vmatpush.bf16.msrb.mxu0 %v1578_v11  ;;  %1000 = vmatpush.bf16.msrb.mxu1 %v1733_v5 }
 0x25b   :  { %920 = vmatpush.bf16.msrb.mxu3 %v1635_v29 }
 0x25c   :  { %988 = vmatpush.bf16.msrb.mxu0 %v1600_v18  ;;  %1001 = vmatpush.bf16.msrb.mxu1 %v1756_v16 }
 0x25f   :  { %921 = vmatpush.bf16.msrb.mxu3 %v1653_v36 }
 0x260   :  { %989 = vmatpush.bf16.msrb.mxu0 %v1626_v26  ;;  %1002 = vmatpush.bf16.msrb.mxu1 %v1775_v24 }
 0x263   :  { %922 = vmatpush.bf16.msrb.mxu3 %v1693_v53 }
 0x264   :  { %990 = vmatpush.bf16.msrb.mxu0 %v1638_v30  ;;  %1003 = vmatpush.bf16.msrb.mxu1 %v1789_v15 }
 0x267   :  { %923 = vmatpush.bf16.msrb.mxu3 %v1726_v1 }
 0x268   :  { %991 = vmatpush.bf16.msrb.mxu0 %v1656_v39  ;;  %1004 = vmatpush.bf16.msrb.mxu1 %v1803_v32 }
 0x26b   :  { %924 = vmatpush.bf16.msrb.mxu3 %v1745_v12 }
 0x26c   :  { %992 = vmatpush.bf16.msrb.mxu0 %v1671_v46  ;;  %1005 = vmatpush.bf16.msrb.mxu1 %v1815_v35 }
 0x26f   :  { %925 = vmatpush.bf16.msrb.mxu3 %v1759_v19 }
 0x270   :  { %993 = vmatpush.bf16.msrb.mxu0 %v1697_v54  ;;  %1006 = vmatpush.bf16.msrb.mxu1 %v1833_v41 }
 0x2cf   :  { %v726_v47 = vpop.f32.mrf.mxu0 }
 0x2d0   :  { %v745_v27 = vadd.f32 %v726_v47, %v189_v14  ;;  %v739_v2 = vpop.f32.mrf.mxu1 }
 0x2d1   :  { %v743_v45 = vadd.f32 %v1909_v37, %v739_v2 }
 0x2d2   :  { %v1332_v13 = vmul.f32 -1.442695, %v745_v27 }
 0x2d4   :  { %1415 = vpow2.f32 %v1332_v13  ;;  %v218_v13 = vadd.f32 %v1954_v44, %v1912_v57 }
 0x2d5   :  { %v713_v40 = vpop.f32.mrf.mxu3 }
 0x2d6   :  { %v744_v20 = vadd.f32 %v713_v40, %v1896_v51 }
 0x2d7   :  { %v728_v6 = vpop.f32.mrf.mxu0 }
 0x2d8   :  { %v1331_v34 = vmul.f32 -1.442695, %v744_v20  ;;  %v741_v62 = vpop.f32.mrf.mxu1 }
 0x2da   :  { %v1416_v63 = vpop.eup %1415  ;;  %1417 = vpow2.f32 %v1331_v34 }
 0x2db   :  { %v753_v38 = vadd.f32 1.0, %v1416_v63 }
 0x2dd   :  { %v715_v3 = vpop.f32.mrf.mxu3  ;;  %1419 = vrcp.f32 %v753_v38  ;;  %v780_v40 = vand.u32 2147483648, %v753_v38  ;;  %vm774_vm14 = vweird.f32 %v753_v38  ;;  %v778_v6 = vand.u32 2147483647, %v753_v38 }
 0x2df   :  { %v781_v63 = vor.u32 1.1754944e-38, %v780_v40  ;;  %vm779_vm0 = vcmp.eq.f32.partialorder %v778_v6, 8.507059e+37 }
 0x2e0   :  { %v1418_v43 = vpop.eup %1417 }
 0x2e1   :  { %v752_v22 = vadd.f32 1.0, %v1418_v43 }
 0x2e3   :  { %1421 = vrcp.f32 %v752_v22  ;;  %v1420_v48 = vpop.eup %1419  ;;  %v765_v55 = vand.u32 2147483648, %v752_v22  ;;  %v763_v51 = vand.u32 2147483647, %v752_v22  ;;  %vm759_vm10 = vweird.f32 %v752_v22 }
 0x2e4   :  { %v770_v25 = vmul.f32 %v1420_v48, %v753_v38  ;;  %vm775_vm13 = vweird.f32 %v1420_v48 }
 0x2e5   :  { %v766_v49 = vor.u32 1.1754944e-38, %v765_v55  ;;  %vm764_vm12 = vcmp.eq.f32.partialorder %v763_v51, 8.507059e+37  ;;  %vm776_vm15 = vmor %vm774_vm14, %vm775_vm13 }
 0x2e6   :  { %v771_v4 = vsub.f32 1.0, %v770_v25 }
 0x2e8   :  { %v772_v42 = vmul.f32 %v1420_v48, %v771_v4 }
 0x2e9   :  { %v1422_v28 = vpop.eup %1421 }
 0x2ea   :  { %v755_v31 = vmul.f32 %v1422_v28, %v752_v22  ;;  %vm760_vm9 = vweird.f32 %v1422_v28  ;;  %v773_v47 = vadd.f32 %v1420_v48, %v772_v42 }
 0x2eb   :  { %vm761_vm11 = vmor %vm759_vm10, %vm760_vm9 }
 0x2ec   :  { %v756_v33 = vsub.f32 1.0, %v755_v31  ;;  %v777_v62 = vsel %vm776_vm15, %v1420_v48, %v773_v47 }
 0x2ed   :  { %v782_v3 = vsel %vm779_vm0, %v781_v63, %v777_v62 }
 0x2ee   :  { %v757_v21 = vmul.f32 %v1422_v28, %v756_v33  ;;  %v787_v2 = vsub.f32 1.0, %v782_v3  ;;  %v789_v25 = vmul.f32 %v782_v3, %v2016_v9 }
 0x2f0   :  { %v758_v10 = vadd.f32 %v1422_v28, %v757_v21 }
 0x2f2   :  { %v762_v14 = vsel %vm761_vm11, %v1422_v28, %v758_v10 }
 0x2f3   :  { %v767_v27 = vsel %vm764_vm12, %v766_v49, %v762_v14  ;;  %v221_v14 = vadd.f32 %v1958_v52, %v1912_v57 }
 0x2f4   :  { %v784_v20 = vmul.f32 %v767_v27, %v743_v45 }
 0x2f6   :  { %v785_v34 = vadd.f32 %v784_v20, %v218_v13 }
 0x2f8   :  { %1423 = vtanh.f32 %v785_v34 }
 0x2fe   :  { %v1424_v43 = vpop.eup %1423 }
 0x2ff   :  { %v788_v22 = vmul.f32 %v1424_v43, %v787_v2 }
 0x301   :  { %v2055_v28 = vadd.f32 %v789_v25, %v788_v22 }
 0x303   :  { %1333 = vst [vmem:[%s2143_s6 + $0x18] sm:$0xff] %v2055_v28  ;;  %v797_v44 = vpack.c.bf16 %v2055_v28, %v2055_v28 }
 0x305   :  { %806 = vmatmul.bf16.vlgmr.msrb.gmra.mxu2 %v797_v44  ;;  %819 = vmatmul.bf16.vlgmr.msra.gmra.mxu3 %v797_v44 }
 0x306   :  { %832 = vmatmul.bf16.vlgmr.msra.gmra.mxu0 %v797_v44  ;;  %1012 = vmatpush.bf16.msrb.mxu2 %v1597_v17 }
 0x307   :  { %1080 = vmatpush.bf16.msra.mxu3 %v1569_v7  ;;  %1093 = vmatpush.bf16.msra.mxu0 %v1705_v56 }
 0x30a   :  { %1013 = vmatpush.bf16.msrb.mxu2 %v1617_v23 }
 0x30b   :  { %1081 = vmatpush.bf16.msra.mxu3 %v1578_v11  ;;  %1094 = vmatpush.bf16.msra.mxu0 %v1733_v5  ;;  %v192_v11 = vadd.f32 %v1956_v50, %v1904_v8 }
 0x30e   :  { %1014 = vmatpush.bf16.msrb.mxu2 %v1635_v29 }
 0x30f   :  { %1082 = vmatpush.bf16.msra.mxu3 %v1600_v18  ;;  %1095 = vmatpush.bf16.msra.mxu0 %v1756_v16 }
 0x312   :  { %1015 = vmatpush.bf16.msrb.mxu2 %v1653_v36 }
 0x313   :  { %1083 = vmatpush.bf16.msra.mxu3 %v1626_v26  ;;  %1096 = vmatpush.bf16.msra.mxu0 %v1775_v24 }
 0x316   :  { %1016 = vmatpush.bf16.msrb.mxu2 %v1693_v53 }
 0x317   :  { %1084 = vmatpush.bf16.msra.mxu3 %v1638_v30  ;;  %1097 = vmatpush.bf16.msra.mxu0 %v1789_v15 }
 0x31a   :  { %1017 = vmatpush.bf16.msrb.mxu2 %v1726_v1 }
 0x31b   :  { %1085 = vmatpush.bf16.msra.mxu3 %v1656_v39  ;;  %1098 = vmatpush.bf16.msra.mxu0 %v1803_v32 }
 0x31e   :  { %1018 = vmatpush.bf16.msrb.mxu2 %v1745_v12 }
 0x31f   :  { %1086 = vmatpush.bf16.msra.mxu3 %v1671_v46  ;;  %1099 = vmatpush.bf16.msra.mxu0 %v1815_v35 }
 0x322   :  { %1019 = vmatpush.bf16.msrb.mxu2 %v1759_v19 }
 0x323   :  { %1087 = vmatpush.bf16.msra.mxu3 %v1697_v54  ;;  %1100 = vmatpush.bf16.msra.mxu0 %v1833_v41 }
 0x383   :  { %v833_v7 = vpop.f32.mrf.mxu0 }
 0x384   :  { %v837_v42 = vadd.f32 %v1909_v37, %v833_v7 }
 0x388   :  { %v807_v18 = vpop.f32.mrf.mxu2  ;;  %v820_v26 = vpop.f32.mrf.mxu3 }
 0x389   :  { %v838_v30 = vadd.f32 %v807_v18, %v1898_v60  ;;  %v839_v39 = vadd.f32 %v820_v26, %v192_v11 }
 0x38b   :  { %v1334_v56 = vmul.f32 -1.442695, %v838_v30  ;;  %v1335_v5 = vmul.f32 -1.442695, %v839_v39  ;;  %v835_v46 = vpop.f32.mrf.mxu0 }
 0x38d   :  { %1425 = vpow2.f32 %v1334_v56 }
 0x38e   :  { %1427 = vpow2.f32 %v1335_v5 }
 0x390   :  { %v809_v16 = vpop.f32.mrf.mxu2  ;;  %v822_v24 = vpop.f32.mrf.mxu3 }
 0x393   :  { %v1426_v15 = vpop.eup %1425 }
 0x394   :  { %v1428_v54 = vpop.eup %1427  ;;  %v846_v32 = vadd.f32 1.0, %v1426_v15 }
 0x395   :  { %v847_v35 = vadd.f32 1.0, %v1428_v54 }
 0x396   :  { %1429 = vrcp.f32 %v846_v32  ;;  %v859_v60 = vand.u32 2147483648, %v846_v32  ;;  %v857_v33 = vand.u32 2147483647, %v846_v32  ;;  %vm853_vm2 = vweird.f32 %v846_v32 }
 0x397   :  { %1431 = vrcp.f32 %v847_v35  ;;  %v874_v27 = vand.u32 2147483648, %v847_v35  ;;  %vm868_vm6 = vweird.f32 %v847_v35  ;;  %v872_v13 = vand.u32 2147483647, %v847_v35 }
 0x398   :  { %v860_v51 = vor.u32 1.1754944e-38, %v859_v60  ;;  %vm858_vm4 = vcmp.eq.f32.partialorder %v857_v33, 8.507059e+37 }
 0x399   :  { %v875_v6 = vor.u32 1.1754944e-38, %v874_v27  ;;  %vm873_vm8 = vcmp.eq.f32.partialorder %v872_v13, 8.507059e+37  ;;  %v2149_v27 = vld [vmem:[#allocation9_spill] sm:$0xff] }
 0x39c   :  { %v1430_v41 = vpop.eup %1429 }
 0x39d   :  { %v1432_v50 = vpop.eup %1431  ;;  %v849_v9 = vmul.f32 %v1430_v41, %v846_v32  ;;  %vm854_vm1 = vweird.f32 %v1430_v41 }
 0x39e   :  { %v864_v38 = vmul.f32 %v1432_v50, %v847_v35  ;;  %vm855_vm3 = vmor %vm853_vm2, %vm854_vm1  ;;  %vm869_vm5 = vweird.f32 %v1432_v50  ;;  %v223_v35 = vadd.f32 %v1962_v59, %v1912_v57 }
 0x39f   :  { %v850_v48 = vsub.f32 1.0, %v849_v9  ;;  %vm870_vm7 = vmor %vm868_vm6, %vm869_vm5 }
 0x3a0   :  { %v865_v31 = vsub.f32 1.0, %v864_v38 }
 0x3a1   :  { %v851_v4 = vmul.f32 %v1430_v41, %v850_v48 }
 0x3a2   :  { %v866_v55 = vmul.f32 %v1432_v50, %v865_v31 }
 0x3a3   :  { %v852_v21 = vadd.f32 %v1430_v41, %v851_v4 }
 0x3a4   :  { %v867_v45 = vadd.f32 %v1432_v50, %v866_v55 }
 0x3a5   :  { %v856_v10 = vsel %vm855_vm3, %v1430_v41, %v852_v21 }
 0x3a6   :  { %v861_v49 = vsel %vm858_vm4, %v860_v51, %v856_v10  ;;  %v871_v20 = vsel %vm870_vm7, %v1432_v50, %v867_v45  ;;  %v197_v45 = vadd.f32 %v1964_v61, %v1904_v8 }
 0x3a7   :  { %v878_v47 = vmul.f32 %v861_v49, %v837_v42  ;;  %v876_v34 = vsel %vm873_vm8, %v875_v6, %v871_v20 }
 0x3a8   :  { %v881_v62 = vsub.f32 1.0, %v876_v34  ;;  %v883_v2 = vmul.f32 %v876_v34, %v2055_v28 }
 0x3a9   :  { %v879_v40 = vadd.f32 %v878_v47, %v221_v14 }
 0x3ab   :  { %1433 = vtanh.f32 %v879_v40 }
 0x3b1   :  { %v1434_v63 = vpop.eup %1433 }
 0x3b2   :  { %v882_v3 = vmul.f32 %v1434_v63, %v881_v62 }
 0x3b4   :  { %v2094_v43 = vadd.f32 %v883_v2, %v882_v3 }
 0x3b6   :  { %1336 = vst [vmem:[%s2143_s6 + $0x20] sm:$0xff] %v2094_v43  ;;  %v891_v52 = vpack.c.bf16 %v2094_v43, %v2094_v43 }
 0x3b8   :  { %900 = vmatmul.bf16.vlgmr.msra.gmra.mxu1 %v891_v52  ;;  %913 = vmatmul.bf16.vlgmr.msra.gmra.mxu2 %v891_v52 }
 0x3b9   :  { %926 = vmatmul.bf16.vlgmr.msrb.gmra.mxu3 %v891_v52  ;;  %1106 = vmatpush.bf16.msra.mxu1 %v1597_v17  ;;  %v194_v17 = vadd.f32 %v1960_v58, %v1904_v8 }
 0x3bd   :  { %1107 = vmatpush.bf16.msra.mxu1 %v1617_v23 }
 0x3c1   :  { %1108 = vmatpush.bf16.msra.mxu1 %v1635_v29 }
 0x3c5   :  { %1109 = vmatpush.bf16.msra.mxu1 %v1653_v36 }
 0x3c9   :  { %1110 = vmatpush.bf16.msra.mxu1 %v1693_v53 }
 0x3cd   :  { %1111 = vmatpush.bf16.msra.mxu1 %v1726_v1 }
 0x3d1   :  { %1112 = vmatpush.bf16.msra.mxu1 %v1745_v12 }
 0x3d5   :  { %1113 = vmatpush.bf16.msra.mxu1 %v1759_v19 }
 0x435   :  { %v901_v22 = vpop.f32.mrf.mxu1 }
 0x436   :  { %v932_v25 = vadd.f32 %v901_v22, %v1900_v0 }
 0x438   :  { %v1337_v28 = vmul.f32 -1.442695, %v932_v25 }
 0x43a   :  { %1435 = vpow2.f32 %v1337_v28 }
 0x43b   :  { %v914_v23 = vpop.f32.mrf.mxu2 }
 0x43c   :  { %v933_v29 = vadd.f32 %v914_v23, %v194_v17  ;;  %v927_v44 = vpop.f32.mrf.mxu3 }
 0x43d   :  { %v903_v36 = vpop.f32.mrf.mxu1  ;;  %v931_v54 = vadd.f32 %v1909_v37, %v927_v44 }
 0x43e   :  { %v1338_v7 = vmul.f32 -1.442695, %v933_v29 }
 0x440   :  { %v1436_v53 = vpop.eup %1435  ;;  %1437 = vpow2.f32 %v1338_v7 }
 0x441   :  { %v940_v1 = vadd.f32 1.0, %v1436_v53 }
 0x443   :  { %1439 = vrcp.f32 %v940_v1  ;;  %v916_v12 = vpop.f32.mrf.mxu2  ;;  %v953_v39 = vand.u32 2147483648, %v940_v1  ;;  %v951_v56 = vand.u32 2147483647, %v940_v1  ;;  %vm947_vm10 = vweird.f32 %v940_v1 }
 0x444   :  { %v929_v11 = vpop.f32.mrf.mxu3 }
 0x445   :  { %v954_v24 = vor.u32 1.1754944e-38, %v953_v39  ;;  %vm952_vm12 = vcmp.eq.f32.partialorder %v951_v56, 8.507059e+37 }
 0x446   :  { %v1438_v19 = vpop.eup %1437 }
 0x447   :  { %v941_v18 = vadd.f32 1.0, %v1438_v19 }
 0x449   :  { %v1440_v26 = vpop.eup %1439  ;;  %1441 = vrcp.f32 %v941_v18  ;;  %v968_v9 = vand.u32 2147483648, %v941_v18  ;;  %v966_v48 = vand.u32 2147483647, %v941_v18  ;;  %vm962_vm14 = vweird.f32 %v941_v18 }
 0x44a   :  { %v943_v0 = vmul.f32 %v1440_v26, %v940_v1  ;;  %vm948_vm9 = vweird.f32 %v1440_v26 }
 0x44b   :  { %vm949_vm11 = vmor %vm947_vm10, %vm948_vm9  ;;  %v969_v4 = vor.u32 1.1754944e-38, %v968_v9  ;;  %vm967_vm0 = vcmp.eq.f32.partialorder %v966_v48, 8.507059e+37 }
 0x44c   :  { %v944_v30 = vsub.f32 1.0, %v943_v0  ;;  %v2150_v0 = vld [vmem:[#allocation11_spill] sm:$0xff] }
 0x44e   :  { %v945_v58 = vmul.f32 %v1440_v26, %v944_v30  ;;  %v226_v30 = vadd.f32 %v2150_v0, %v1912_v57 }
 0x44f   :  { %v1442_v5 = vpop.eup %1441 }
 0x450   :  { %v958_v46 = vmul.f32 %v1442_v5, %v941_v18  ;;  %v946_v16 = vadd.f32 %v1440_v26, %v945_v58  ;;  %vm963_vm13 = vweird.f32 %v1442_v5 }
 0x451   :  { %vm964_vm15 = vmor %vm962_vm14, %vm963_vm13 }
 0x452   :  { %v959_v15 = vsub.f32 1.0, %v958_v46  ;;  %v950_v32 = vsel %vm949_vm11, %v1440_v26, %v946_v16 }
 0x453   :  { %v955_v41 = vsel %vm952_vm12, %v954_v24, %v950_v32 }
 0x454   :  { %v960_v50 = vmul.f32 %v1442_v5, %v959_v15  ;;  %v972_v38 = vmul.f32 %v955_v41, %v931_v54 }
 0x456   :  { %v961_v60 = vadd.f32 %v1442_v5, %v960_v50  ;;  %v973_v31 = vadd.f32 %v972_v38, %v223_v35  ;;  %v2151_v50 = vld [vmem:[#allocation12_spill] sm:$0xff] }
 0x457   :  { %v199_v9 = vadd.f32 %v2151_v50, %v1904_v8 }
 0x458   :  { %v965_v33 = vsel %vm964_vm15, %v1442_v5, %v961_v60  ;;  %1443 = vtanh.f32 %v973_v31 }
 0x459   :  { %v970_v55 = vsel %vm967_vm0, %v969_v4, %v965_v33  ;;  %v2152_v33 = vld [vmem:[#allocation10_spill] sm:$0xff] }
 0x45a   :  { %v975_v21 = vsub.f32 1.0, %v970_v55  ;;  %v977_v59 = vmul.f32 %v970_v55, %v2094_v43 }
 0x45e   :  { %v1444_v51 = vpop.eup %1443 }
 0x45f   :  { %v976_v42 = vmul.f32 %v1444_v51, %v975_v21 }
 0x461   :  { %v978_v10 = vadd.f32 %v977_v59, %v976_v42 }
 0x463   :  { %1339 = vst [vmem:[%s2143_s6 + $0x28] sm:$0xff] %v978_v10  ;;  %v985_v49 = vpack.c.bf16 %v978_v10, %v978_v10 }
 0x465   :  { %994 = vmatmul.bf16.vlgmr.msrb.gmra.mxu0 %v985_v49  ;;  %1007 = vmatmul.bf16.vlgmr.msrb.gmra.mxu1 %v985_v49 }
 0x466   :  { %1020 = vmatmul.bf16.vlgmr.msrb.gmra.mxu2 %v985_v49 }
 0x4e2   :  { %v995_v14 = vpop.f32.mrf.mxu0  ;;  %v1008_v47 = vpop.f32.mrf.mxu1 }
 0x4e3   :  { %v1026_v13 = vadd.f32 %v995_v14, %v2149_v27  ;;  %v1027_v40 = vadd.f32 %v1008_v47, %v197_v45 }
 0x4e5   :  { %v1340_v20 = vmul.f32 -1.442695, %v1026_v13  ;;  %v1341_v6 = vmul.f32 -1.442695, %v1027_v40 }
 0x4e7   :  { %1445 = vpow2.f32 %v1340_v20 }
 0x4e8   :  { %1447 = vpow2.f32 %v1341_v6 }
 0x4e9   :  { %v1021_v34 = vpop.f32.mrf.mxu2 }
 0x4ea   :  { %v997_v62 = vpop.f32.mrf.mxu0  ;;  %v1010_v63 = vpop.f32.mrf.mxu1  ;;  %v1025_v11 = vadd.f32 %v1909_v37, %v1021_v34 }
 0x4ed   :  { %v1446_v3 = vpop.eup %1445 }
 0x4ee   :  { %v1448_v2 = vpop.eup %1447  ;;  %v1034_v43 = vadd.f32 1.0, %v1446_v3 }
 0x4ef   :  { %v1035_v52 = vadd.f32 1.0, %v1448_v2 }
 0x4f0   :  { %1449 = vrcp.f32 %v1034_v43  ;;  %v1047_v44 = vand.u32 2147483648, %v1034_v43  ;;  %v1045_v7 = vand.u32 2147483647, %v1034_v43  ;;  %vm1041_vm2 = vweird.f32 %v1034_v43 }
 0x4f1   :  { %1451 = vrcp.f32 %v1035_v52  ;;  %v1023_v22 = vpop.f32.mrf.mxu2  ;;  %v1062_v39 = vand.u32 2147483648, %v1035_v52  ;;  %vm1056_vm6 = vweird.f32 %v1035_v52  ;;  %v1060_v56 = vand.u32 2147483647, %v1035_v52 }
 0x4f2   :  { %v1048_v12 = vor.u32 1.1754944e-38, %v1047_v44  ;;  %vm1046_vm4 = vcmp.eq.f32.partialorder %v1045_v7, 8.507059e+37 }
 0x4f3   :  { %v1063_v16 = vor.u32 1.1754944e-38, %v1062_v39  ;;  %vm1061_vm8 = vcmp.eq.f32.partialorder %v1060_v56, 8.507059e+37 }
 0x4f6   :  { %v1450_v61 = vpop.eup %1449 }
 0x4f7   :  { %v1452_v25 = vpop.eup %1451  ;;  %v1037_v28 = vmul.f32 %v1450_v61, %v1034_v43  ;;  %vm1042_vm1 = vweird.f32 %v1450_v61  ;;  %v1465_v43 = vld [vmem:[#allocation5] ss:$0 sm:$0xff] }
 0x4f8   :  { %v1052_v17 = vmul.f32 %v1452_v25, %v1035_v52  ;;  %vm1043_vm3 = vmor %vm1041_vm2, %vm1042_vm1  ;;  %vm1057_vm5 = vweird.f32 %v1452_v25 }
 0x4f9   :  { %v1038_v23 = vsub.f32 1.0, %v1037_v28  ;;  %vm1058_vm7 = vmor %vm1056_vm6, %vm1057_vm5  ;;  %v2153_v28 = vld [vmem:[#allocation13_spill] sm:$0xff] }
 0x4fa   :  { %v1053_v29 = vsub.f32 1.0, %v1052_v17  ;;  %v228_v17 = vadd.f32 %v2153_v28, %v1912_v57 }
 0x4fb   :  { %v1039_v36 = vmul.f32 %v1450_v61, %v1038_v23 }
 0x4fc   :  { %v1054_v53 = vmul.f32 %v1452_v25, %v1053_v29 }
 0x4fd   :  { %v1040_v1 = vadd.f32 %v1450_v61, %v1039_v36 }
 0x4fe   :  { %v1055_v18 = vadd.f32 %v1452_v25, %v1054_v53 }
 0x4ff   :  { %v1044_v19 = vsel %vm1043_vm3, %v1450_v61, %v1040_v1 }
 0x500   :  { %v1049_v26 = vsel %vm1046_vm4, %v1048_v12, %v1044_v19  ;;  %v1059_v46 = vsel %vm1058_vm7, %v1452_v25, %v1055_v18 }
 0x501   :  { %v1066_v58 = vmul.f32 %v1049_v26, %v1025_v11  ;;  %v1064_v24 = vsel %vm1061_vm8, %v1063_v16, %v1059_v46 }
 0x502   :  { %v1069_v37 = vsub.f32 1.0, %v1064_v24  ;;  %v1071_v32 = vmul.f32 %v1064_v24, %v978_v10 }
 0x503   :  { %v1067_v5 = vadd.f32 %v1066_v58, %v226_v30 }
 0x505   :  { %1453 = vtanh.f32 %v1067_v5 }
 0x50b   :  { %v1454_v15 = vpop.eup %1453 }
 0x50c   :  { %v1070_v54 = vmul.f32 %v1454_v15, %v1069_v37 }
 0x50e   :  { %v1072_v35 = vadd.f32 %v1071_v32, %v1070_v54 }
 0x510   :  { %1342 = vst [vmem:[%s2143_s6 + $0x30] sm:$0xff] %v1072_v35  ;;  %v1079_v41 = vpack.c.bf16 %v1072_v35, %v1072_v35 }
 0x512   :  { %1088 = vmatmul.bf16.vlgmr.msra.gmra.mxu3 %v1079_v41  ;;  %1101 = vmatmul.bf16.vlgmr.msra.gmra.mxu0 %v1079_v41 }
 0x513   :  { %1114 = vmatmul.bf16.vlgmr.msra.gmra.mxu1 %v1079_v41 }
 0x58f   :  { %v1102_v38 = vpop.f32.mrf.mxu0 }
 0x590   :  { %v1121_v48 = vadd.f32 %v1102_v38, %v199_v9  ;;  %v1115_v60 = vpop.f32.mrf.mxu1 }
 0x591   :  { %v1119_v52 = vadd.f32 %v1465_v43, %v1115_v60 }
 0x592   :  { %v1344_v31 = vmul.f32 -1.442695, %v1121_v48 }
 0x594   :  { %1455 = vpow2.f32 %v1344_v31 }
 0x595   :  { %v1089_v4 = vpop.f32.mrf.mxu3 }
 0x596   :  { %v1120_v55 = vadd.f32 %v1089_v4, %v2152_v33 }
 0x597   :  { %v1104_v21 = vpop.f32.mrf.mxu0 }
 0x598   :  { %v1343_v51 = vmul.f32 -1.442695, %v1120_v55  ;;  %v1117_v42 = vpop.f32.mrf.mxu1 }
 0x59a   :  { %v1456_v59 = vpop.eup %1455  ;;  %1457 = vpow2.f32 %v1343_v51 }
 0x59b   :  { %v1129_v10 = vadd.f32 1.0, %v1456_v59 }
 0x59d   :  { %v1091_v49 = vpop.f32.mrf.mxu3  ;;  %1459 = vrcp.f32 %v1129_v10  ;;  %v1156_v23 = vand.u32 2147483648, %v1129_v10  ;;  %vm1150_vm14 = vweird.f32 %v1129_v10  ;;  %v1154_v44 = vand.u32 2147483647, %v1129_v10 }
 0x59f   :  { %v1157_v53 = vor.u32 1.1754944e-38, %v1156_v23  ;;  %vm1155_vm0 = vcmp.eq.f32.partialorder %v1154_v44, 8.507059e+37 }
 0x5a0   :  { %v1458_v45 = vpop.eup %1457 }
 0x5a1   :  { %v1128_v14 = vadd.f32 1.0, %v1458_v45 }
 0x5a3   :  { %1461 = vrcp.f32 %v1128_v14  ;;  %v1460_v8 = vpop.eup %1459  ;;  %v1141_v6 = vand.u32 2147483648, %v1128_v14  ;;  %v1139_v62 = vand.u32 2147483647, %v1128_v14  ;;  %vm1135_vm10 = vweird.f32 %v1128_v14 }
 0x5a4   :  { %v1146_v47 = vmul.f32 %v1460_v8, %v1129_v10  ;;  %vm1151_vm13 = vweird.f32 %v1460_v8 }
 0x5a5   :  { %v1142_v2 = vor.u32 1.1754944e-38, %v1141_v6  ;;  %vm1140_vm12 = vcmp.eq.f32.partialorder %v1139_v62, 8.507059e+37  ;;  %vm1152_vm15 = vmor %vm1150_vm14, %vm1151_vm13 }
 0x5a6   :  { %v1147_v40 = vsub.f32 1.0, %v1146_v47 }
 0x5a8   :  { %v1148_v63 = vmul.f32 %v1460_v8, %v1147_v40 }
 0x5a9   :  { %v1462_v27 = vpop.eup %1461 }
 0x5aa   :  { %v1131_v13 = vmul.f32 %v1462_v27, %v1128_v14  ;;  %vm1136_vm9 = vweird.f32 %v1462_v27  ;;  %v1149_v61 = vadd.f32 %v1460_v8, %v1148_v63 }
 0x5ab   :  { %vm1137_vm11 = vmor %vm1135_vm10, %vm1136_vm9 }
 0x5ac   :  { %v1132_v20 = vsub.f32 1.0, %v1131_v13  ;;  %v1153_v7 = vsel %vm1152_vm15, %v1460_v8, %v1149_v61 }
 0x5ad   :  { %v1158_v1 = vsel %vm1155_vm0, %v1157_v53, %v1153_v7 }
 0x5ae   :  { %v1133_v34 = vmul.f32 %v1462_v27, %v1132_v20  ;;  %v1163_v12 = vsub.f32 1.0, %v1158_v1  ;;  %v1165_v19 = vmul.f32 %v1158_v1, %v1072_v35 }
 0x5b0   :  { %v1134_v3 = vadd.f32 %v1462_v27, %v1133_v34 }
 0x5b2   :  { %v1138_v22 = vsel %vm1137_vm11, %v1462_v27, %v1134_v3 }
 0x5b3   :  { %v1143_v25 = vsel %vm1140_vm12, %v1142_v2, %v1138_v22 }
 0x5b4   :  { %v1160_v29 = vmul.f32 %v1143_v25, %v1119_v52 }
 0x5b6   :  { %v1161_v36 = vadd.f32 %v1160_v29, %v228_v17 }
 0x5b8   :  { %1463 = vtanh.f32 %v1161_v36 }
 0x5be   :  { %v1464_v11 = vpop.eup %1463 }
 0x5bf   :  { %v1164_v18 = vmul.f32 %v1464_v11, %v1163_v12 }
 0x5c1   :  { %v1166_v26 = vadd.f32 %v1165_v19, %v1164_v18 }
 0x5c3   :  { %1345 = vst [vmem:[%s2143_s6 + $0x38] sm:$0xff] %v1166_v26 }
 0x5c4   :  { %1173 = vsyncpa [#allocation4], 1 }
 0x5c5   :  { %1174 = vsyncpa [#allocation6], 1 }

</bundles_post_ra>
